<compile_context>
chip_gen: v7x
topology: tpu7x:2x2x1
jax: 0.10.0
libtpu: 0.0.40
codegen_flags: <defaults>
</compile_context>

<pallas_src>
import jax
import jax.numpy as jnp
from jax import lax
from jax.experimental import pallas as pl
from jax.experimental.pallas import tpu as pltpu


def _cga_kernel(bcol_ref, brow_ref, x_ref, u_ref,
                w1n_ref, b1n_ref, w2n_ref, b2n_ref,
                w1q_ref, b1q_ref, w2q_ref, b2q_ref,
                w1g_ref, b1g_ref, w2g_ref, b2g_ref,
                acc_out_ref, max_out_ref, sum_out_ref,
                q_sc, eye_sc, acc_sc, max_sc, sum_sc):
    step = pl.program_id(1)                       # node-tile axis (carries the softmax state)
    last = pl.num_programs(1) - 1
    tile_n = x_ref.shape[0]
    bpad = acc_sc.shape[0]
    f32 = jnp.float32
    bf16 = jnp.bfloat16
    NEG = jnp.float32(-1e30)

    @pl.when(step == 0)
    def _init():
        # ques_nn(u): tiny [Bpad, Cpad] MLP, computed in f32 once per part and
        # stored as bf16 (it only feeds the per-tile gather matmul).
        q = jnp.dot(u_ref[...], w1q_ref[...], preferred_element_type=f32) + b1q_ref[...]
        q = jnp.maximum(q, 0.0)
        q = jnp.dot(q, w2q_ref[...], preferred_element_type=f32) + b2q_ref[...]
        q_sc[...] = q.astype(bf16)
        # tiny identity, reused every step to turn [1,Bpad] row scales into columns.
        eye_sc[...] = (lax.broadcasted_iota(jnp.int32, (bpad, bpad), 0)
                       == lax.broadcasted_iota(jnp.int32, (bpad, bpad), 1)).astype(f32)
        acc_sc[...] = jnp.zeros_like(acc_sc)
        max_sc[...] = jnp.full_like(max_sc, NEG)
        sum_sc[...] = jnp.zeros_like(sum_sc)

    # ---- node_nn(x) for this tile: bf16 MXU feeds, f32 accumulation ----------
    xb = x_ref[...].astype(bf16)                                    # [tile_n, F_in]
    h = jnp.dot(xb, w1n_ref[...], preferred_element_type=f32) + b1n_ref[...]
    h = jnp.maximum(h, 0.0)
    h = jnp.dot(h.astype(bf16), w2n_ref[...], preferred_element_type=f32) + b2n_ref[...]

    # ---- membership masks from int32 batch ids (padding rows carry -1) -------
    bcol = bcol_ref[...]                                            # [tile_n, 1] int32
    brow = brow_ref[...]                                            # [1, tile_n] int32
    mask_nm = (lax.broadcasted_iota(jnp.int32, (tile_n, bpad), 1) == bcol)   # node-major
    mask_bm = (lax.broadcasted_iota(jnp.int32, (bpad, tile_n), 0) == brow)   # batch-major
    valid = bcol >= 0                                               # [tile_n, 1]

    # ---- gather ques_nn(u)[batch]: [tile_n,Bpad] @ [Bpad,Cpad] ----------------
    q_n = jnp.dot(mask_nm.astype(bf16), q_sc[...], preferred_element_type=f32)

    # ---- gate_nn(q_n * h): Lin -> ReLU -> Lin(C,1) (last layer via lane reduce)
    g = jnp.dot((q_n * h).astype(bf16), w1g_ref[...],
                preferred_element_type=f32) + b1g_ref[...]
    g = jnp.maximum(g, 0.0)
    logits = jnp.sum(g * w2g_ref[...], axis=1, keepdims=True) + b2g_ref[0]   # [tile_n, 1]

    # ---- flash-style segment softmax carry (all f32) --------------------------
    tile_max = jnp.max(jnp.where(mask_nm, logits, NEG), axis=0, keepdims=True)   # [1, Bpad]
    new_max = jnp.maximum(max_sc[...], tile_max)
    scale_row = jnp.exp(max_sc[...] - new_max)                                   # [1, Bpad]
    node_max = jnp.sum(jnp.where(mask_nm, new_max, 0.0), axis=1, keepdims=True)  # [tile_n,1]
    e = jnp.exp(jnp.where(valid, logits - node_max, NEG))                        # [tile_n,1]
    sum_sc[...] = sum_sc[...] * scale_row + jnp.sum(jnp.where(mask_nm, e, 0.0),
                                                    axis=0, keepdims=True)
    max_sc[...] = new_max
    scale_col = jnp.sum(eye_sc[...] * scale_row, axis=1, keepdims=True)          # [Bpad, 1]
    # scatter-add into the per-graph accumulator: [Bpad,tile_n] @ [tile_n,Cpad]
    acc_sc[...] = acc_sc[...] * scale_col + jnp.dot(
        mask_bm.astype(bf16), (e * h).astype(bf16), preferred_element_type=f32)

    @pl.when(step == last)
    def _finalize():
        # Per-part partials (unnormalized); the flash-merge happens in the wrapper.
        acc_out_ref[...] = acc_sc[...]
        max_out_ref[...] = max_sc[...].reshape(1, 1, bpad)
        sum_out_ref[...] = sum_sc[...].reshape(1, 1, bpad)


def _round_up(x, m):
    return (x + m - 1) // m * m


def conditional_global_attention(x, u, batch, params, num_graphs, *,
                                 tile_n=2048, num_parts=2):
    """x: [N, F_in] f32, u: [B, C] f32, batch: [N] int32 (values in [0, B))."""
    assert tile_n % 128 == 0, "tile_n must be a multiple of 128 (lane-dense tiles)"
    f32, bf16 = jnp.float32, jnp.bfloat16
    if x.ndim == 1:
        x = x[:, None]
    n, f_in = x.shape
    b, c = int(num_graphs), u.shape[1]
    c_pad = _round_up(c, 128)
    # small B: 8-row pad (cheap masks); large B: lane-dense 128 pad for the MXU.
    b_pad = _round_up(b, 8) if b <= 64 else _round_up(b, 128)

    tiles_total = pl.cdiv(max(n, 1), tile_n)
    num_parts = max(1, min(num_parts, tiles_total))
    tiles_per_part = pl.cdiv(tiles_total, num_parts)
    n_pad = num_parts * tiles_per_part * tile_n

    # x keeps its raw feature width (the only O(N) stream); rows are zero-padded
    # so padded nodes contribute exactly 0 everywhere (no NaN risk).
    xp = jnp.zeros((n_pad, f_in), f32).at[:n, :].set(x.astype(f32))
    up = jnp.zeros((b_pad, c_pad), f32).at[:b, :c].set(u.astype(f32))
    bi = batch.astype(jnp.int32)
    bcol = jnp.full((n_pad, 1), -1, jnp.int32).at[:n, 0].set(bi)
    brow = jnp.full((1, n_pad), -1, jnp.int32).at[0, :n].set(bi)

    def pad2(a, rows, cols, dtype):
        return jnp.zeros((rows, cols), dtype).at[:a.shape[0], :a.shape[1]].set(a.astype(dtype))

    # bf16 weights feed the MXU; biases / ques_nn / gate layer-2 stay f32.
    w1n = pad2(params["w1n"], f_in, c_pad, bf16); b1n = pad2(params["b1n"], 1, c_pad, f32)
    w2n = pad2(params["w2n"], c_pad, c_pad, bf16); b2n = pad2(params["b2n"], 1, c_pad, f32)
    w1q = pad2(params["w1q"], c_pad, c_pad, f32);  b1q = pad2(params["b1q"], 1, c_pad, f32)
    w2q = pad2(params["w2q"], c_pad, c_pad, f32);  b2q = pad2(params["b2q"], 1, c_pad, f32)
    w1g = pad2(params["w1g"], c_pad, c_pad, bf16); b1g = pad2(params["b1g"], 1, c_pad, f32)
    w2g_row = pad2(params["w2g"].reshape(1, -1), 1, c_pad, f32)      # [C,1] -> [1,Cpad] row
    b2g_s = params["b2g"].reshape(-1).astype(f32)[:1]                # scalar bias -> SMEM

    node_map = lambda p, i: (p * tiles_per_part + i, 0)
    res = lambda p, i: (0, 0)
    in_specs = [
        pl.BlockSpec((tile_n, 1), node_map),                                  # batch ids (col)
        pl.BlockSpec((1, tile_n), lambda p, i: (0, p * tiles_per_part + i)),  # batch ids (row)
        pl.BlockSpec((tile_n, f_in), node_map),                               # x tile (raw width)
        pl.BlockSpec((b_pad, c_pad), res),                                    # u
        pl.BlockSpec((f_in, c_pad), res), pl.BlockSpec((1, c_pad), res),      # node_nn l1
        pl.BlockSpec((c_pad, c_pad), res), pl.BlockSpec((1, c_pad), res),     # node_nn l2
        pl.BlockSpec((c_pad, c_pad), res), pl.BlockSpec((1, c_pad), res),     # ques_nn l1
        pl.BlockSpec((c_pad, c_pad), res), pl.BlockSpec((1, c_pad), res),     # ques_nn l2
        pl.BlockSpec((c_pad, c_pad), res), pl.BlockSpec((1, c_pad), res),     # gate_nn l1
        pl.BlockSpec((1, c_pad), res),                                        # gate_nn l2 weight
        pl.BlockSpec(memory_space=pltpu.MemorySpace.SMEM),                    # gate_nn l2 bias
    ]
    out_specs = (
        pl.BlockSpec((b_pad, c_pad), lambda p, i: (p, 0)),            # per-part acc (unnormalized)
        pl.BlockSpec((1, 1, b_pad), lambda p, i: (p, 0, 0)),          # per-part running max
        pl.BlockSpec((1, 1, b_pad), lambda p, i: (p, 0, 0)),          # per-part running sum
    )
    out_shape = (
        jax.ShapeDtypeStruct((num_parts * b_pad, c_pad), f32),
        jax.ShapeDtypeStruct((num_parts, 1, b_pad), f32),
        jax.ShapeDtypeStruct((num_parts, 1, b_pad), f32),
    )
    scratch = [
        pltpu.VMEM((b_pad, c_pad), bf16),   # ques_nn(u), computed once per part
        pltpu.VMEM((b_pad, b_pad), f32),    # identity (row->column scale transpose)
        pltpu.VMEM((b_pad, c_pad), f32),    # running output accumulator
        pltpu.VMEM((1, b_pad), f32),        # running per-graph max
        pltpu.VMEM((1, b_pad), f32),        # running per-graph sum
    ]

    inputs = (bcol, brow, xp, up, w1n, b1n, w2n, b2n, w1q, b1q, w2q, b2q,
              w1g, b1g, w2g_row, b2g_s)
    flops = int(2 * n_pad * c_pad * (f_in + 2 * c_pad + 2 * b_pad + 1)
                + num_parts * 4 * b_pad * c_pad * c_pad)
    out_bytes = 4 * (num_parts * b_pad * c_pad + 2 * num_parts * b_pad)
    bytes_accessed = int(sum(int(a.size) * a.dtype.itemsize for a in inputs) + out_bytes)
    transcendentals = int(n_pad + 2 * num_parts * tiles_per_part * b_pad)
    cost = pl.CostEstimate(flops=flops, transcendentals=transcendentals,
                           bytes_accessed=bytes_accessed)
    vmem_limit = int(min(56 * 1024 * 1024, 16 * tile_n * c_pad * 4 + 16 * 1024 * 1024))

    acc, mx, sm = pl.pallas_call(
        _cga_kernel,
        out_shape=out_shape,
        grid=(num_parts, tiles_per_part),
        in_specs=in_specs,
        out_specs=out_specs,
        scratch_shapes=scratch,
        compiler_params=pltpu.CompilerParams(
            # leading axis: independent per-core partials (megacore split on v7x);
            # trailing axis carries the flash-softmax state -> arbitrary.
            dimension_semantics=("parallel", "arbitrary"),
            vmem_limit_bytes=vmem_limit,
        ),
        cost_estimate=cost,
    )(*inputs)

    # ---- tiny cross-part flash-softmax merge (O(B*C), plain JAX) -------------
    acc = acc.reshape(num_parts, b_pad, c_pad)
    mx = mx[:, 0, :]                                    # [P, Bpad]
    sm = sm[:, 0, :]                                    # [P, Bpad]
    gmax = jnp.max(mx, axis=0)                          # [Bpad]
    w = jnp.exp(mx - gmax[None, :])                     # [P, Bpad]
    denom = jnp.sum(sm * w, axis=0) + 1e-16             # [Bpad]
    num = jnp.sum(acc * w[:, :, None], axis=0)          # [Bpad, Cpad]
    out = num / denom[:, None]
    return out[:b, :c]


def _reference(x, u, batch, params, num_graphs):
    """Pure-JAX (f32) reference mirroring the PyTorch forward."""
    relu = jax.nn.relu
    h = relu(x @ params["w1n"] + params["b1n"]) @ params["w2n"] + params["b2n"]
    q = relu(u @ params["w1q"] + params["b1q"]) @ params["w2q"] + params["b2q"]
    q_n = q[batch]
    g = relu((q_n * h) @ params["w1g"] + params["b1g"]) @ params["w2g"] + params["b2g"]
    g = g[:, 0]
    seg_max = jax.ops.segment_max(g, batch, num_segments=num_graphs)
    e = jnp.exp(g - seg_max[batch])
    seg_sum = jax.ops.segment_sum(e, batch, num_segments=num_graphs)
    gate = (e / (seg_sum[batch] + 1e-16))[:, None]
    return jax.ops.segment_sum(gate * h, batch, num_segments=num_graphs)


def _init_linear(key, fan_in, fan_out):
    # deterministic stand-in for PyTorch Linear default init (uniform +-1/sqrt(fan_in))
    kw, kb = jax.random.split(key)
    bound = 1.0 / (fan_in ** 0.5)
    w = jax.random.uniform(kw, (fan_in, fan_out), jnp.float32, -bound, bound)
    b = jax.random.uniform(kb, (1, fan_out), jnp.float32, -bound, bound)
    return w, b


if __name__ == "__main__":
    key = jax.random.PRNGKey(0)
    N, B = 300, 2                    # total nodes (split 140 / 160), number of graphs
    F_IN, C = 12, 32                 # num_node_features, num_out_features
    TILE_N = 128                     # small tile so the test exercises the multi-tile
                                     # flash carry AND the cross-part combine
                                     # (production default is tile_n=2048)

    keys = jax.random.split(key, 10)
    params = {}
    params["w1n"], params["b1n"] = _init_linear(keys[0], F_IN, C)   # node_nn layer 1
    params["w2n"], params["b2n"] = _init_linear(keys[1], C, C)      # node_nn layer 2
    params["w1q"], params["b1q"] = _init_linear(keys[2], C, C)      # ques_nn layer 1
    params["w2q"], params["b2q"] = _init_linear(keys[3], C, C)      # ques_nn layer 2
    params["w1g"], params["b1g"] = _init_linear(keys[4], C, C)      # gate_nn layer 1
    params["w2g"], params["b2g"] = _init_linear(keys[5], C, 1)      # gate_nn layer 2

    x = jax.random.normal(keys[6], (N, F_IN), jnp.float32)
    u = jax.random.normal(keys[7], (B, C), jnp.float32)
    batch = jnp.concatenate([jnp.zeros((140,), jnp.int32),
                             jnp.ones((160,), jnp.int32)])          # sorted graph assignment

    out = conditional_global_attention(x, u, batch, params, B,
                                       tile_n=TILE_N, num_parts=2)
    out = jax.block_until_ready(out)

    ref = _reference(x, u, batch, params, B)
    assert out.shape == (B, C)
    # bf16 MXU feeds (f32 accumulation, f32 softmax carry): tolerance relaxed
    # from the previous all-f32 2e-4.
    assert jnp.allclose(out, ref, atol=1.5e-2, rtol=1.5e-2), (out, ref)

    print("KERNEL_OK")
</pallas_src>

<mosaic_0001>
module attributes {stable_mosaic.version = 11 : i64} {
  func.func @_cga_kernel(%arg0: i32, %arg1: i32, %arg2: memref<128x1xi32, #tpu.memory_space<vmem>>, %arg3: memref<1x128xi32, #tpu.memory_space<vmem>>, %arg4: memref<128x12xf32, #tpu.memory_space<vmem>>, %arg5: memref<8x128xf32, #tpu.memory_space<vmem>>, %arg6: memref<12x128xbf16, #tpu.memory_space<vmem>>, %arg7: memref<1x128xf32, #tpu.memory_space<vmem>>, %arg8: memref<128x128xbf16, #tpu.memory_space<vmem>>, %arg9: memref<1x128xf32, #tpu.memory_space<vmem>>, %arg10: memref<128x128xf32, #tpu.memory_space<vmem>>, %arg11: memref<1x128xf32, #tpu.memory_space<vmem>>, %arg12: memref<128x128xf32, #tpu.memory_space<vmem>>, %arg13: memref<1x128xf32, #tpu.memory_space<vmem>>, %arg14: memref<128x128xbf16, #tpu.memory_space<vmem>>, %arg15: memref<1x128xf32, #tpu.memory_space<vmem>>, %arg16: memref<1x128xf32, #tpu.memory_space<vmem>>, %arg17: memref<1xf32, #tpu.memory_space<smem>>, %arg18: memref<8x128xf32, #tpu.memory_space<vmem>>, %arg19: memref<1x1x8xf32, #tpu.memory_space<vmem>>, %arg20: memref<1x1x8xf32, #tpu.memory_space<vmem>>, %arg21: memref<8x128xbf16, #tpu.memory_space<vmem>>, %arg22: memref<8x8xf32, #tpu.memory_space<vmem>>, %arg23: memref<8x128xf32, #tpu.memory_space<vmem>>, %arg24: memref<1x8xf32, #tpu.memory_space<vmem>>, %arg25: memref<1x8xf32, #tpu.memory_space<vmem>>) attributes {dimension_semantics = [#tpu.dimension_semantics<parallel>, #tpu.dimension_semantics<arbitrary>], iteration_bounds = array<i64: 2, 2>, scalar_prefetch = 0 : i64, scratch_operands = 5 : i64, tpu.core_type = #tpu.core_type<tc>, window_params = [{transform_indices = @transform_0, window_bounds = array<i64: 128, 1>}, {transform_indices = @transform_1, window_bounds = array<i64: 1, 128>}, {transform_indices = @transform_2, window_bounds = array<i64: 128, 12>}, {pipeline_mode = #tpu.pipeline_mode<synchronous>, transform_indices = @transform_3, window_bounds = array<i64: 8, 128>}, {pipeline_mode = #tpu.pipeline_mode<synchronous>, transform_indices = @transform_4, window_bounds = array<i64: 12, 128>}, {pipeline_mode = #tpu.pipeline_mode<synchronous>, transform_indices = @transform_5, window_bounds = array<i64: 1, 128>}, {pipeline_mode = #tpu.pipeline_mode<synchronous>, transform_indices = @transform_6, window_bounds = array<i64: 128, 128>}, {pipeline_mode = #tpu.pipeline_mode<synchronous>, transform_indices = @transform_7, window_bounds = array<i64: 1, 128>}, {pipeline_mode = #tpu.pipeline_mode<synchronous>, transform_indices = @transform_8, window_bounds = array<i64: 128, 128>}, {pipeline_mode = #tpu.pipeline_mode<synchronous>, transform_indices = @transform_9, window_bounds = array<i64: 1, 128>}, {pipeline_mode = #tpu.pipeline_mode<synchronous>, transform_indices = @transform_10, window_bounds = array<i64: 128, 128>}, {pipeline_mode = #tpu.pipeline_mode<synchronous>, transform_indices = @transform_11, window_bounds = array<i64: 1, 128>}, {pipeline_mode = #tpu.pipeline_mode<synchronous>, transform_indices = @transform_12, window_bounds = array<i64: 128, 128>}, {pipeline_mode = #tpu.pipeline_mode<synchronous>, transform_indices = @transform_13, window_bounds = array<i64: 1, 128>}, {pipeline_mode = #tpu.pipeline_mode<synchronous>, transform_indices = @transform_14, window_bounds = array<i64: 1, 128>}, {transform_indices = @transform_15, window_bounds = array<i64: 1>}, {transform_indices = @transform_16, window_bounds = array<i64: 8, 128>}, {transform_indices = @transform_17, window_bounds = array<i64: 1, 1, 8>}, {transform_indices = @transform_18, window_bounds = array<i64: 1, 1, 8>}]} {
    %c0_i32 = arith.constant 0 : i32
    %0 = arith.cmpi eq, %arg1, %c0_i32 : i32
    %1 = arith.extui %0 : i1 to i32
    %cst = arith.constant -1.000000e+30 : f32
    %c0_i32_0 = arith.constant 0 : i32
    %2 = arith.cmpi ne, %1, %c0_i32_0 : i32
    scf.if %2 {
      %c0_57 = arith.constant 0 : index
      %c0_58 = arith.constant 0 : index
      %102 = vector.load %arg5[%c0_57, %c0_58] : memref<8x128xf32, #tpu.memory_space<vmem>>, vector<8x128xf32>
      %c0_59 = arith.constant 0 : index
      %c0_60 = arith.constant 0 : index
      %103 = vector.load %arg10[%c0_59, %c0_60] : memref<128x128xf32, #tpu.memory_space<vmem>>, vector<128x128xf32>
      %cst_61 = arith.constant dense<0.000000e+00> : vector<8x128xf32>
      %104 = tpu.matmul %102, %103, %cst_61 {dimension_numbers = #tpu.dot_dimension_numbers<[1], [0], [0], [1], [0, 0, 1, 1], [], []>} : vector<8x128xf32>, vector<128x128xf32>, vector<8x128xf32> -> vector<8x128xf32>
      %c0_62 = arith.constant 0 : index
      %c0_63 = arith.constant 0 : index
      %105 = vector.load %arg11[%c0_62, %c0_63] : memref<1x128xf32, #tpu.memory_space<vmem>>, vector<1x128xf32>
      %106 = vector.broadcast %105 : vector<1x128xf32> to vector<8x128xf32>
      %107 = arith.addf %104, %106 : vector<8x128xf32>
      %cst_64 = arith.constant 0.000000e+00 : f32
      %108 = vector.broadcast %cst_64 : f32 to vector<8x128xf32>
      %109 = arith.maximumf %107, %108 : vector<8x128xf32>
      %c0_65 = arith.constant 0 : index
      %c0_66 = arith.constant 0 : index
      %110 = vector.load %arg12[%c0_65, %c0_66] : memref<128x128xf32, #tpu.memory_space<vmem>>, vector<128x128xf32>
      %cst_67 = arith.constant dense<0.000000e+00> : vector<8x128xf32>
      %111 = tpu.matmul %109, %110, %cst_67 {dimension_numbers = #tpu.dot_dimension_numbers<[1], [0], [0], [1], [0, 0, 1, 1], [], []>} : vector<8x128xf32>, vector<128x128xf32>, vector<8x128xf32> -> vector<8x128xf32>
      %c0_68 = arith.constant 0 : index
      %c0_69 = arith.constant 0 : index
      %112 = vector.load %arg13[%c0_68, %c0_69] : memref<1x128xf32, #tpu.memory_space<vmem>>, vector<1x128xf32>
      %113 = vector.broadcast %112 : vector<1x128xf32> to vector<8x128xf32>
      %114 = arith.addf %111, %113 : vector<8x128xf32>
      %115 = arith.truncf %114 : vector<8x128xf32> to vector<8x128xbf16>
      %c0_70 = arith.constant 0 : index
      %c0_71 = arith.constant 0 : index
      %116 = vector.load %arg21[%c0_70, %c0_71] : memref<8x128xbf16, #tpu.memory_space<vmem>>, vector<8x128xbf16>
      tpu.vector_store %arg21[%c0_70, %c0_71], %115 {strides = array<i32>} : memref<8x128xbf16, #tpu.memory_space<vmem>>, vector<8x128xbf16>,
      %117 = tpu.iota {dimensions = array<i32: 0>} : vector<8x8xi32>
      %118 = tpu.iota {dimensions = array<i32: 1>} : vector<8x8xi32>
      %119 = arith.cmpi eq, %117, %118 : vector<8x8xi32>
      %120 = arith.extui %119 : vector<8x8xi1> to vector<8x8xi32>
      %121 = arith.sitofp %120 : vector<8x8xi32> to vector<8x8xf32>
      %c0_72 = arith.constant 0 : index
      %c0_73 = arith.constant 0 : index
      %122 = vector.load %arg22[%c0_72, %c0_73] : memref<8x8xf32, #tpu.memory_space<vmem>>, vector<8x8xf32>
      tpu.vector_store %arg22[%c0_72, %c0_73], %121 {strides = array<i32>} : memref<8x8xf32, #tpu.memory_space<vmem>>, vector<8x8xf32>,
      %cst_74 = arith.constant 0.000000e+00 : f32
      %123 = vector.broadcast %cst_74 : f32 to vector<8x128xf32>
      %c0_75 = arith.constant 0 : index
      %c0_76 = arith.constant 0 : index
      %124 = vector.load %arg23[%c0_75, %c0_76] : memref<8x128xf32, #tpu.memory_space<vmem>>, vector<8x128xf32>
      tpu.vector_store %arg23[%c0_75, %c0_76], %123 {strides = array<i32>} : memref<8x128xf32, #tpu.memory_space<vmem>>, vector<8x128xf32>,
      %125 = vector.broadcast %cst : f32 to vector<1x8xf32>
      %c0_77 = arith.constant 0 : index
      %c0_78 = arith.constant 0 : index
      %126 = vector.load %arg24[%c0_77, %c0_78] : memref<1x8xf32, #tpu.memory_space<vmem>>, vector<1x8xf32>
      tpu.vector_store %arg24[%c0_77, %c0_78], %125 {strides = array<i32>} : memref<1x8xf32, #tpu.memory_space<vmem>>, vector<1x8xf32>,
      %cst_79 = arith.constant 0.000000e+00 : f32
      %127 = vector.broadcast %cst_79 : f32 to vector<1x8xf32>
      %c0_80 = arith.constant 0 : index
      %c0_81 = arith.constant 0 : index
      %128 = vector.load %arg25[%c0_80, %c0_81] : memref<1x8xf32, #tpu.memory_space<vmem>>, vector<1x8xf32>
      tpu.vector_store %arg25[%c0_80, %c0_81], %127 {strides = array<i32>} : memref<1x8xf32, #tpu.memory_space<vmem>>, vector<1x8xf32>,
    } else {
    }
    %c0 = arith.constant 0 : index
    %c0_1 = arith.constant 0 : index
    %3 = vector.load %arg4[%c0, %c0_1] : memref<128x12xf32, #tpu.memory_space<vmem>>, vector<128x12xf32>
    %4 = arith.truncf %3 : vector<128x12xf32> to vector<128x12xbf16>
    %c0_2 = arith.constant 0 : index
    %c0_3 = arith.constant 0 : index
    %5 = vector.load %arg6[%c0_2, %c0_3] : memref<12x128xbf16, #tpu.memory_space<vmem>>, vector<12x128xbf16>
    %cst_4 = arith.constant dense<0.000000e+00> : vector<128x128xf32>
    %6 = tpu.matmul %4, %5, %cst_4 {dimension_numbers = #tpu.dot_dimension_numbers<[1], [0], [0], [1], [0, 0, 1, 1], [], []>} : vector<128x12xbf16>, vector<12x128xbf16>, vector<128x128xf32> -> vector<128x128xf32>
    %c0_5 = arith.constant 0 : index
    %c0_6 = arith.constant 0 : index
    %7 = vector.load %arg7[%c0_5, %c0_6] : memref<1x128xf32, #tpu.memory_space<vmem>>, vector<1x128xf32>
    %8 = vector.broadcast %7 : vector<1x128xf32> to vector<128x128xf32>
    %9 = arith.addf %6, %8 : vector<128x128xf32>
    %cst_7 = arith.constant 0.000000e+00 : f32
    %10 = vector.broadcast %cst_7 : f32 to vector<128x128xf32>
    %11 = arith.maximumf %9, %10 : vector<128x128xf32>
    %12 = arith.truncf %11 : vector<128x128xf32> to vector<128x128xbf16>
    %c0_8 = arith.constant 0 : index
    %c0_9 = arith.constant 0 : index
    %13 = vector.load %arg8[%c0_8, %c0_9] : memref<128x128xbf16, #tpu.memory_space<vmem>>, vector<128x128xbf16>
    %cst_10 = arith.constant dense<0.000000e+00> : vector<128x128xf32>
    %14 = tpu.matmul %12, %13, %cst_10 {dimension_numbers = #tpu.dot_dimension_numbers<[1], [0], [0], [1], [0, 0, 1, 1], [], []>} : vector<128x128xbf16>, vector<128x128xbf16>, vector<128x128xf32> -> vector<128x128xf32>
    %c0_11 = arith.constant 0 : index
    %c0_12 = arith.constant 0 : index
    %15 = vector.load %arg9[%c0_11, %c0_12] : memref<1x128xf32, #tpu.memory_space<vmem>>, vector<1x128xf32>
    %16 = vector.broadcast %15 : vector<1x128xf32> to vector<128x128xf32>
    %17 = arith.addf %14, %16 : vector<128x128xf32>
    %c0_13 = arith.constant 0 : index
    %c0_14 = arith.constant 0 : index
    %18 = vector.load %arg2[%c0_13, %c0_14] : memref<128x1xi32, #tpu.memory_space<vmem>>, vector<128x1xi32>
    %c0_15 = arith.constant 0 : index
    %c0_16 = arith.constant 0 : index
    %19 = vector.load %arg3[%c0_15, %c0_16] : memref<1x128xi32, #tpu.memory_space<vmem>>, vector<1x128xi32>
    %20 = tpu.iota {dimensions = array<i32: 1>} : vector<128x8xi32>
    %21 = vector.broadcast %18 : vector<128x1xi32> to vector<128x8xi32>
    %22 = arith.cmpi eq, %20, %21 : vector<128x8xi32>
    %23 = tpu.iota {dimensions = array<i32: 0>} : vector<8x128xi32>
    %24 = vector.broadcast %19 : vector<1x128xi32> to vector<8x128xi32>
    %25 = arith.cmpi eq, %23, %24 : vector<8x128xi32>
    %c0_i32_17 = arith.constant 0 : i32
    %26 = vector.broadcast %c0_i32_17 : i32 to vector<128x1xi32>
    %27 = arith.cmpi sge, %18, %26 : vector<128x1xi32>
    %28 = arith.extui %22 : vector<128x8xi1> to vector<128x8xi32>
    %29 = arith.sitofp %28 : vector<128x8xi32> to vector<128x8xf32>
    %30 = arith.truncf %29 : vector<128x8xf32> to vector<128x8xbf16>
    %c0_18 = arith.constant 0 : index
    %c0_19 = arith.constant 0 : index
    %31 = vector.load %arg21[%c0_18, %c0_19] : memref<8x128xbf16, #tpu.memory_space<vmem>>, vector<8x128xbf16>
    %cst_20 = arith.constant dense<0.000000e+00> : vector<128x128xf32>
    %32 = tpu.matmul %30, %31, %cst_20 {dimension_numbers = #tpu.dot_dimension_numbers<[1], [0], [0], [1], [0, 0, 1, 1], [], []>} : vector<128x8xbf16>, vector<8x128xbf16>, vector<128x128xf32> -> vector<128x128xf32>
    %33 = arith.mulf %32, %17 : vector<128x128xf32>
    %34 = arith.truncf %33 : vector<128x128xf32> to vector<128x128xbf16>
    %c0_21 = arith.constant 0 : index
    %c0_22 = arith.constant 0 : index
    %35 = vector.load %arg14[%c0_21, %c0_22] : memref<128x128xbf16, #tpu.memory_space<vmem>>, vector<128x128xbf16>
    %cst_23 = arith.constant dense<0.000000e+00> : vector<128x128xf32>
    %36 = tpu.matmul %34, %35, %cst_23 {dimension_numbers = #tpu.dot_dimension_numbers<[1], [0], [0], [1], [0, 0, 1, 1], [], []>} : vector<128x128xbf16>, vector<128x128xbf16>, vector<128x128xf32> -> vector<128x128xf32>
    %c0_24 = arith.constant 0 : index
    %c0_25 = arith.constant 0 : index
    %37 = vector.load %arg15[%c0_24, %c0_25] : memref<1x128xf32, #tpu.memory_space<vmem>>, vector<1x128xf32>
    %38 = vector.broadcast %37 : vector<1x128xf32> to vector<128x128xf32>
    %39 = arith.addf %36, %38 : vector<128x128xf32>
    %cst_26 = arith.constant 0.000000e+00 : f32
    %40 = vector.broadcast %cst_26 : f32 to vector<128x128xf32>
    %41 = arith.maximumf %39, %40 : vector<128x128xf32>
    %c0_27 = arith.constant 0 : index
    %c0_28 = arith.constant 0 : index
    %42 = vector.load %arg16[%c0_27, %c0_28] : memref<1x128xf32, #tpu.memory_space<vmem>>, vector<1x128xf32>
    %43 = vector.broadcast %42 : vector<1x128xf32> to vector<128x128xf32>
    %44 = arith.mulf %41, %43 : vector<128x128xf32>
    %cst_29 = arith.constant dense<0.000000e+00> : vector<128xf32>
    %45 = vector.multi_reduction <add>, %44, %cst_29 [1] : vector<128x128xf32> to vector<128xf32>
    %46 = vector.shape_cast %45 : vector<128xf32> to vector<128x1xf32>
    %c0_30 = arith.constant 0 : index
    %47 = memref.load %arg17[%c0_30] : memref<1xf32, #tpu.memory_space<smem>>
    %48 = vector.broadcast %47 : f32 to vector<128x1xf32>
    %49 = arith.addf %46, %48 : vector<128x1xf32>
    %cst_31 = arith.constant -1.000000e+30 : f32
    %50 = vector.shape_cast %49 : vector<128x1xf32> to vector<128x1xf32>
    %51 = vector.broadcast %50 : vector<128x1xf32> to vector<128x8xf32>
    %52 = vector.broadcast %cst_31 : f32 to vector<128x8xf32>
    %53 = arith.select %22, %51, %52 : vector<128x8xi1>, vector<128x8xf32>
    %cst_32 = arith.constant dense<0xFF800000> : vector<8xf32>
    %54 = vector.multi_reduction <maximumf>, %53, %cst_32 [0] : vector<128x8xf32> to vector<8xf32>
    %55 = vector.shape_cast %54 : vector<8xf32> to vector<1x8xf32>
    %c0_33 = arith.constant 0 : index
    %c0_34 = arith.constant 0 : index
    %56 = vector.load %arg24[%c0_33, %c0_34] : memref<1x8xf32, #tpu.memory_space<vmem>>, vector<1x8xf32>
    %57 = arith.maximumf %56, %55 : vector<1x8xf32>
    %c0_35 = arith.constant 0 : index
    %c0_36 = arith.constant 0 : index
    %58 = vector.load %arg24[%c0_35, %c0_36] : memref<1x8xf32, #tpu.memory_space<vmem>>, vector<1x8xf32>
    %59 = arith.subf %58, %57 : vector<1x8xf32>
    %60 = math.exp %59 : vector<1x8xf32>
    %cst_37 = arith.constant 0.000000e+00 : f32
    %61 = vector.shape_cast %57 : vector<1x8xf32> to vector<1x8xf32>
    %62 = vector.broadcast %61 : vector<1x8xf32> to vector<128x8xf32>
    %63 = vector.broadcast %cst_37 : f32 to vector<128x8xf32>
    %64 = arith.select %22, %62, %63 : vector<128x8xi1>, vector<128x8xf32>
    %cst_38 = arith.constant dense<0.000000e+00> : vector<128xf32>
    %65 = vector.multi_reduction <add>, %64, %cst_38 [1] : vector<128x8xf32> to vector<128xf32>
    %66 = vector.shape_cast %65 : vector<128xf32> to vector<128x1xf32>
    %67 = arith.subf %49, %66 : vector<128x1xf32>
    %cst_39 = arith.constant -1.000000e+30 : f32
    %68 = vector.broadcast %cst_39 : f32 to vector<128x1xf32>
    %69 = arith.select %27, %67, %68 : vector<128x1xi1>, vector<128x1xf32>
    %70 = math.exp %69 : vector<128x1xf32>
    %c0_40 = arith.constant 0 : index
    %c0_41 = arith.constant 0 : index
    %71 = vector.load %arg25[%c0_40, %c0_41] : memref<1x8xf32, #tpu.memory_space<vmem>>, vector<1x8xf32>
    %72 = arith.mulf %71, %60 : vector<1x8xf32>
    %cst_42 = arith.constant 0.000000e+00 : f32
    %73 = vector.shape_cast %70 : vector<128x1xf32> to vector<128x1xf32>
    %74 = vector.broadcast %73 : vector<128x1xf32> to vector<128x8xf32>
    %75 = vector.broadcast %cst_42 : f32 to vector<128x8xf32>
    %76 = arith.select %22, %74, %75 : vector<128x8xi1>, vector<128x8xf32>
    %cst_43 = arith.constant dense<0.000000e+00> : vector<8xf32>
    %77 = vector.multi_reduction <add>, %76, %cst_43 [0] : vector<128x8xf32> to vector<8xf32>
    %78 = vector.shape_cast %77 : vector<8xf32> to vector<1x8xf32>
    %79 = arith.addf %72, %78 : vector<1x8xf32>
    %c0_44 = arith.constant 0 : index
    %c0_45 = arith.constant 0 : index
    %80 = vector.load %arg25[%c0_44, %c0_45] : memref<1x8xf32, #tpu.memory_space<vmem>>, vector<1x8xf32>
    tpu.vector_store %arg25[%c0_44, %c0_45], %79 {strides = array<i32>} : memref<1x8xf32, #tpu.memory_space<vmem>>, vector<1x8xf32>,
    %c0_46 = arith.constant 0 : index
    %c0_47 = arith.constant 0 : index
    %81 = vector.load %arg24[%c0_46, %c0_47] : memref<1x8xf32, #tpu.memory_space<vmem>>, vector<1x8xf32>
    tpu.vector_store %arg24[%c0_46, %c0_47], %57 {strides = array<i32>} : memref<1x8xf32, #tpu.memory_space<vmem>>, vector<1x8xf32>,
    %c0_48 = arith.constant 0 : index
    %c0_49 = arith.constant 0 : index
    %82 = vector.load %arg22[%c0_48, %c0_49] : memref<8x8xf32, #tpu.memory_space<vmem>>, vector<8x8xf32>
    %83 = vector.broadcast %60 : vector<1x8xf32> to vector<8x8xf32>
    %84 = arith.mulf %82, %83 : vector<8x8xf32>
    %cst_50 = arith.constant dense<0.000000e+00> : vector<8xf32>
    %85 = vector.multi_reduction <add>, %84, %cst_50 [1] : vector<8x8xf32> to vector<8xf32>
    %86 = vector.shape_cast %85 : vector<8xf32> to vector<8x1xf32>
    %c0_51 = arith.constant 0 : index
    %c0_52 = arith.constant 0 : index
    %87 = vector.load %arg23[%c0_51, %c0_52] : memref<8x128xf32, #tpu.memory_space<vmem>>, vector<8x128xf32>
    %88 = vector.broadcast %86 : vector<8x1xf32> to vector<8x128xf32>
    %89 = arith.mulf %87, %88 : vector<8x128xf32>
    %90 = arith.extui %25 : vector<8x128xi1> to vector<8x128xi32>
    %91 = arith.sitofp %90 : vector<8x128xi32> to vector<8x128xf32>
    %92 = arith.truncf %91 : vector<8x128xf32> to vector<8x128xbf16>
    %93 = vector.broadcast %70 : vector<128x1xf32> to vector<128x128xf32>
    %94 = arith.mulf %93, %17 : vector<128x128xf32>
    %95 = arith.truncf %94 : vector<128x128xf32> to vector<128x128xbf16>
    %cst_53 = arith.constant dense<0.000000e+00> : vector<8x128xf32>
    %96 = tpu.matmul %92, %95, %cst_53 {dimension_numbers = #tpu.dot_dimension_numbers<[1], [0], [0], [1], [0, 0, 1, 1], [], []>} : vector<8x128xbf16>, vector<128x128xbf16>, vector<8x128xf32> -> vector<8x128xf32>
    %97 = arith.addf %89, %96 : vector<8x128xf32>
    %c0_54 = arith.constant 0 : index
    %c0_55 = arith.constant 0 : index
    %98 = vector.load %arg23[%c0_54, %c0_55] : memref<8x128xf32, #tpu.memory_space<vmem>>, vector<8x128xf32>
    tpu.vector_store %arg23[%c0_54, %c0_55], %97 {strides = array<i32>} : memref<8x128xf32, #tpu.memory_space<vmem>>, vector<8x128xf32>,
    %c1_i32 = arith.constant 1 : i32
    %99 = arith.cmpi eq, %arg1, %c1_i32 : i32
    %100 = arith.extui %99 : i1 to i32
    %c0_i32_56 = arith.constant 0 : i32
    %101 = arith.cmpi ne, %100, %c0_i32_56 : i32
    scf.if %101 {
      %c0_57 = arith.constant 0 : index
      %c0_58 = arith.constant 0 : index
      %102 = vector.load %arg23[%c0_57, %c0_58] : memref<8x128xf32, #tpu.memory_space<vmem>>, vector<8x128xf32>
      %c0_59 = arith.constant 0 : index
      %c0_60 = arith.constant 0 : index
      %103 = vector.load %arg18[%c0_59, %c0_60] : memref<8x128xf32, #tpu.memory_space<vmem>>, vector<8x128xf32>
      tpu.vector_store %arg18[%c0_59, %c0_60], %102 {strides = array<i32>} : memref<8x128xf32, #tpu.memory_space<vmem>>, vector<8x128xf32>,
      %c0_61 = arith.constant 0 : index
      %c0_62 = arith.constant 0 : index
      %104 = vector.load %arg24[%c0_61, %c0_62] : memref<1x8xf32, #tpu.memory_space<vmem>>, vector<1x8xf32>
      %105 = vector.shape_cast %104 : vector<1x8xf32> to vector<1x1x8xf32>
      %c0_63 = arith.constant 0 : index
      %c0_64 = arith.constant 0 : index
      %c0_65 = arith.constant 0 : index
      %106 = vector.load %arg19[%c0_63, %c0_64, %c0_65] : memref<1x1x8xf32, #tpu.memory_space<vmem>>, vector<1x1x8xf32>
      tpu.vector_store %arg19[%c0_63, %c0_64, %c0_65], %105 {strides = array<i32>} : memref<1x1x8xf32, #tpu.memory_space<vmem>>, vector<1x1x8xf32>,
      %c0_66 = arith.constant 0 : index
      %c0_67 = arith.constant 0 : index
      %107 = vector.load %arg25[%c0_66, %c0_67] : memref<1x8xf32, #tpu.memory_space<vmem>>, vector<1x8xf32>
      %108 = vector.shape_cast %107 : vector<1x8xf32> to vector<1x1x8xf32>
      %c0_68 = arith.constant 0 : index
      %c0_69 = arith.constant 0 : index
      %c0_70 = arith.constant 0 : index
      %109 = vector.load %arg20[%c0_68, %c0_69, %c0_70] : memref<1x1x8xf32, #tpu.memory_space<vmem>>, vector<1x1x8xf32>
      tpu.vector_store %arg20[%c0_68, %c0_69, %c0_70], %108 {strides = array<i32>} : memref<1x1x8xf32, #tpu.memory_space<vmem>>, vector<1x1x8xf32>,
    } else {
    }
    return
  }
  func.func @transform_0(%arg0: i32, %arg1: i32) -> (i32, i32) {
    %c2_i32 = arith.constant 2 : i32
    %0 = arith.muli %arg0, %c2_i32 : i32
    %1 = arith.addi %0, %arg1 : i32
    %c0_i32 = arith.constant 0 : i32
    %c0_i32_0 = arith.constant 0 : i32
    return %1, %c0_i32 : i32, i32
  }
  func.func @transform_1(%arg0: i32, %arg1: i32) -> (i32, i32) {
    %c2_i32 = arith.constant 2 : i32
    %0 = arith.muli %arg0, %c2_i32 : i32
    %1 = arith.addi %0, %arg1 : i32
    %c0_i32 = arith.constant 0 : i32
    %c0_i32_0 = arith.constant 0 : i32
    return %c0_i32, %1 : i32, i32
  }
  func.func @transform_2(%arg0: i32, %arg1: i32) -> (i32, i32) {
    %c2_i32 = arith.constant 2 : i32
    %0 = arith.muli %arg0, %c2_i32 : i32
    %1 = arith.addi %0, %arg1 : i32
    %c0_i32 = arith.constant 0 : i32
    %c0_i32_0 = arith.constant 0 : i32
    return %1, %c0_i32 : i32, i32
  }
  func.func @transform_3(%arg0: i32, %arg1: i32) -> (i32, i32) {
    %c0_i32 = arith.constant 0 : i32
    %c0_i32_0 = arith.constant 0 : i32
    %c0_i32_1 = arith.constant 0 : i32
    return %c0_i32, %c0_i32_0 : i32, i32
  }
  func.func @transform_4(%arg0: i32, %arg1: i32) -> (i32, i32) {
    %c0_i32 = arith.constant 0 : i32
    %c0_i32_0 = arith.constant 0 : i32
    %c0_i32_1 = arith.constant 0 : i32
    return %c0_i32, %c0_i32_0 : i32, i32
  }
  func.func @transform_5(%arg0: i32, %arg1: i32) -> (i32, i32) {
    %c0_i32 = arith.constant 0 : i32
    %c0_i32_0 = arith.constant 0 : i32
    %c0_i32_1 = arith.constant 0 : i32
    return %c0_i32, %c0_i32_0 : i32, i32
  }
  func.func @transform_6(%arg0: i32, %arg1: i32) -> (i32, i32) {
    %c0_i32 = arith.constant 0 : i32
    %c0_i32_0 = arith.constant 0 : i32
    %c0_i32_1 = arith.constant 0 : i32
    return %c0_i32, %c0_i32_0 : i32, i32
  }
  func.func @transform_7(%arg0: i32, %arg1: i32) -> (i32, i32) {
    %c0_i32 = arith.constant 0 : i32
    %c0_i32_0 = arith.constant 0 : i32
    %c0_i32_1 = arith.constant 0 : i32
    return %c0_i32, %c0_i32_0 : i32, i32
  }
  func.func @transform_8(%arg0: i32, %arg1: i32) -> (i32, i32) {
    %c0_i32 = arith.constant 0 : i32
    %c0_i32_0 = arith.constant 0 : i32
    %c0_i32_1 = arith.constant 0 : i32
    return %c0_i32, %c0_i32_0 : i32, i32
  }
  func.func @transform_9(%arg0: i32, %arg1: i32) -> (i32, i32) {
    %c0_i32 = arith.constant 0 : i32
    %c0_i32_0 = arith.constant 0 : i32
    %c0_i32_1 = arith.constant 0 : i32
    return %c0_i32, %c0_i32_0 : i32, i32
  }
  func.func @transform_10(%arg0: i32, %arg1: i32) -> (i32, i32) {
    %c0_i32 = arith.constant 0 : i32
    %c0_i32_0 = arith.constant 0 : i32
    %c0_i32_1 = arith.constant 0 : i32
    return %c0_i32, %c0_i32_0 : i32, i32
  }
  func.func @transform_11(%arg0: i32, %arg1: i32) -> (i32, i32) {
    %c0_i32 = arith.constant 0 : i32
    %c0_i32_0 = arith.constant 0 : i32
    %c0_i32_1 = arith.constant 0 : i32
    return %c0_i32, %c0_i32_0 : i32, i32
  }
  func.func @transform_12(%arg0: i32, %arg1: i32) -> (i32, i32) {
    %c0_i32 = arith.constant 0 : i32
    %c0_i32_0 = arith.constant 0 : i32
    %c0_i32_1 = arith.constant 0 : i32
    return %c0_i32, %c0_i32_0 : i32, i32
  }
  func.func @transform_13(%arg0: i32, %arg1: i32) -> (i32, i32) {
    %c0_i32 = arith.constant 0 : i32
    %c0_i32_0 = arith.constant 0 : i32
    %c0_i32_1 = arith.constant 0 : i32
    return %c0_i32, %c0_i32_0 : i32, i32
  }
  func.func @transform_14(%arg0: i32, %arg1: i32) -> (i32, i32) {
    %c0_i32 = arith.constant 0 : i32
    %c0_i32_0 = arith.constant 0 : i32
    %c0_i32_1 = arith.constant 0 : i32
    return %c0_i32, %c0_i32_0 : i32, i32
  }
  func.func @transform_15(%arg0: i32, %arg1: i32) -> i32 {
    %c0_i32 = arith.constant 0 : i32
    %c0_i32_0 = arith.constant 0 : i32
    return %c0_i32 : i32
  }
  func.func @transform_16(%arg0: i32, %arg1: i32) -> (i32, i32) {
    %c0_i32 = arith.constant 0 : i32
    %c0_i32_0 = arith.constant 0 : i32
    return %arg0, %c0_i32 : i32, i32
  }
  func.func @transform_17(%arg0: i32, %arg1: i32) -> (i32, i32, i32) {
    %c0_i32 = arith.constant 0 : i32
    %c0_i32_0 = arith.constant 0 : i32
    %c0_i32_1 = arith.constant 0 : i32
    return %arg0, %c0_i32, %c0_i32_0 : i32, i32, i32
  }
  func.func @transform_18(%arg0: i32, %arg1: i32) -> (i32, i32, i32) {
    %c0_i32 = arith.constant 0 : i32
    %c0_i32_0 = arith.constant 0 : i32
    %c0_i32_1 = arith.constant 0 : i32
    return %arg0, %c0_i32, %c0_i32_0 : i32, i32, i32
  }
}

</mosaic_0001>

<bundles_post_ra>
// kernel: tpu_custom_call.1
= control target key start
LH: loop header
LB: loop body
LE: loop exit
PB: predicated region body
PF: predicated region fallthrough
CT: control target
= control target key end

     0   :  { %s4284_s0 = inlined_call_operand.vmem [shape: s32[512,1], index: 0, kind: input, shape index: {}]   ;;  %s4285_s1 = inlined_call_operand.vmem [shape: s32[1,512], index: 1, kind: input, shape index: {}]   ;;  %s4286_s2 = inlined_call_operand.vmem [shape: f32[512,12], index: 2, kind: input, shape index: {}]   ;;  %s4287_s3 = inlined_call_operand.vmem [shape: f32[8,128], index: 3, kind: input, shape index: {}]   ;;  %s4288_s4 = inlined_call_operand.vmem [shape: bf16[12,128], index: 4, kind: input, shape index: {}]   ;;  %s4289_s5 = inlined_call_operand.vmem [shape: f32[1,128], index: 5, kind: input, shape index: {}]   ;;  %s4290_s6 = inlined_call_operand.vmem [shape: bf16[128,128], index: 6, kind: input, shape index: {}]   ;;  %s4291_s7 = inlined_call_operand.vmem [shape: f32[1,128], index: 7, kind: input, shape index: {}]   ;;  %s4292_s8 = inlined_call_operand.vmem [shape: f32[128,128], index: 8, kind: input, shape index: {}]   ;;  %s4293_s9 = inlined_call_operand.vmem [shape: f32[1,128], index: 9, kind: input, shape index: {}]   ;;  %s4294_s10 = inlined_call_operand.vmem [shape: f32[128,128], index: 10, kind: input, shape index: {}]   ;;  %s4295_s11 = inlined_call_operand.vmem [shape: f32[1,128], index: 11, kind: input, shape index: {}]   ;;  %s4296_s12 = inlined_call_operand.vmem [shape: bf16[128,128], index: 12, kind: input, shape index: {}]   ;;  %s4297_s13 = inlined_call_operand.vmem [shape: f32[1,128], index: 13, kind: input, shape index: {}]   ;;  %s4298_s14 = inlined_call_operand.vmem [shape: f32[1,128], index: 14, kind: input, shape index: {}]   ;;  %s4299_s15 = inlined_call_operand.<no memory space> [shape: f32[1], index: 15, kind: input, shape index: {}]   ;;  %s4300_s16 = inlined_call_operand.hbm [shape: f32[16,128], index: 16, kind: output, shape index: {0}]   ;;  %s4301_s17 = inlined_call_operand.hbm [shape: f32[2,1,8], index: 17, kind: output, shape index: {1}]   ;;  %s4302_s18 = inlined_call_operand.hbm [shape: f32[2,1,8], index: 18, kind: output, shape index: {2}]  }
   0x1   :  { %4342 = sst [smem:[#allocation38_spill]] %s4284_s0 }
   0x2   :  { %4343 = sst [smem:[#allocation39_spill]] %s4285_s1 }
   0x3   :  { %4344 = sst [smem:[#allocation40_spill]] %s4286_s2 }
   0x4   :  { %4345 = sst [smem:[#allocation41_spill]] %s4297_s13 }
   0x5   :  { %4346 = sst [smem:[#allocation42_spill]] %s4298_s14 }
   0x6   :  { %4347 = sst [smem:[#allocation43_spill]] %s4300_s16 }
   0x7   :  { %4348 = sst [smem:[#allocation44_spill]] %s4301_s17 }
   0x8   :  { %4349 = sst [smem:[#allocation45_spill]] %s4302_s18 }
   0x9   :  { %24 = sst [smem:[#allocation7]] %s4299_s15 }
   0xa   :  { %25 = vsyncpa [#allocation9], 0 }
   0xb   :  { %27 = vsyncpa [#allocation9 + $0x1], 0 }
   0xc   :  { %28 = vsyncpa [#allocation11], 0 }
   0xd   :  { %30 = vsyncpa [#allocation11 + $0x1], 0  ;;  %s3259_s29 = smov 0   ;;  %s3261_s30 = smov 0  }
   0xe   :  { %s3263_s0 = smov 0   ;;  %s3265_s19 = smov 0  }
   0xf   :  { %s3267_s1 = smov 0   ;;  %s3269_s20 = smov 0  }
  0x10   :  { %s3271_s21 = smov 0   ;;  %s3273_s22 = smov 0  }
  0x11 LB: > { %4350 = sst [smem:[#allocation15_spill]] %s3120_s29  ;;  %s4303_s15 = sadd.s32 4294967295, %s3148_s22   ;;  %s3148_s22 = sphi %s3273_s22, %s36_s22   ;;  %s3144_s21 = sphi %s3271_s21, %s4423_s21   ;;  %s3140_s20 = sphi %s3269_s20, %s4422_s20   ;;  %s3136_s1 = sphi %s3267_s1, %s4421_s1   ;;  %s3132_s19 = sphi %s3265_s19, %s4420_s19   ;;  %s3128_s0 = sphi %s3263_s0, %s4419_s0   ;;  %s3124_s30 = sphi %s3261_s30, %s4418_s30   ;;  %s3120_s29 = sphi %s3259_s29, %s4417_s29  }
  0x12   : > { %4351 = sst [smem:[#allocation16_spill]] %s3124_s30  ;;  %s4304_s2 = sadd.s32 4294967294, %s3148_s22  }
  0x13   : > { %4352 = sst [smem:[#allocation17_spill]] %s3128_s0  ;;  %s45_s23 = sadd.s32 1, %s3140_s20 }
  0x14   : > { %4353 = sst [smem:[#allocation18_spill]] %s3136_s1  ;;  %p46_p0 = scmp.ge.s32.totalorder %s45_s23, 2 }
  0x15   : > { %4354 = sst [smem:[#allocation19_spill]] %s3140_s20  ;;  %s48_s24 = sadd.s32 1, %s3144_s21 }
  0x16   : > { %4355 = sst [smem:[#allocation20_spill]] %s3144_s21  ;;  %p428_p1 = scmp.ne.s32.totalorder %s3128_s0, %s3124_s30 }
  0x17   : > { %4356 = sst [smem:[#allocation21_spill]] %s3148_s22  ;;  %p429_p2 = scmp.eq.s32.totalorder %s4303_s15, 3 }
  0x18   : > { %s4425_s23 = smov (%p46_p0, %s45_s23), 0  ;;  %s4427_s24 = smov (!%p46_p0, %s48_s24), %s3144_s21 }
  0x19   : > { %4357 = sst [smem:[#allocation22_spill]] %s4425_s23  ;;  %p3310_p3 = por %p429_p2, %p428_p1 }
  0x1a   : > { %p434_p4 = scmp.ne.s32.totalorder %s3124_s30, %s3120_s29  ;;  %p50_p5 = scmp.ge.s32.totalorder %s4427_s24, 2 }
  0x1b   : > { %s4358_s25 = scalar_select %p3310_p3, 1, 0 }
  0x1c   : > { %p435_p6 = scmp.eq.s32.totalorder %s4304_s2, 3  ;;  %p2426_p7 = scmp.ge.s32.totalorder %s3148_s22, 1 }
  0x1d   : > { %4359 = sst [smem:[#allocation23_spill]] %s4358_s25  ;;  %p580_p8 = scmp.lt.s32.totalorder %s3148_s22, 5 }
  0x1e   : > { %s4429_s24 = smov (%p50_p5, %s4427_s24), 0  ;;  %p3322_p9 = por %p435_p6, %p434_p4 }
  0x1f   : > { %4360 = sst [smem:[#allocation24_spill]] %s4429_s24  ;;  %p581_p10 = pnand %p2426_p7, %p580_p8 }
  0x20   : > { %s4361_s26 = scalar_select %p3322_p9, 1, 0 }
  0x21   : > { %s415_s27 = ssub.s32 %s3144_s21, %s4429_s24  ;;  %s418_s28 = sadd.s32 1, %s3128_s0 }
  0x22   : > { %4362 = sst [smem:[#allocation25_spill]] %s4361_s26  ;;  %p416_p11 = scmp.eq.s32.totalorder %s415_s27, 0 }
  0x23   : > { %584 = sbr.rel (%p581_p10) target bundleno = 2014 (0x7de), region = 84 }
  0x24   : > { %s3330_s15 = scalar_select %p416_p11, %s3128_s0, %s418_s28  }
  0x26   : > { %4363 = sst [smem:[#allocation26_spill]] %s3330_s15 }
  0x2a   : > { %s3333_s2 = sand.u32 1, %s3124_s30   ;;  %s2428_s23 = sshll.u32 %s3136_s1, 1 }
  0x2b   : > { %s2427_s20 = sshll.u32 %s3333_s2, 3  ;;  %s657_s29 = sadd.s32 %s3132_s19, %s2428_s23 }
  0x2c   : > { %s2429_s18 = sshll.u32 %s657_s29, 4  ;;  %p668_p12 = scmp.lt.s32.totalorder %s657_s29, 3 }
  0x2d   : > { %p659_p13 = scmp.lt.s32.totalorder %s2429_s18, 63  ;;  %s4364_s24 = sld [smem:[#allocation39_spill]] }
  0x2e   : > { %s4431_s29 = smov (!%p668_p12, %s657_s29), 3  ;;  %s4365_s26 = sld [smem:[#allocation38_spill]] }
  0x2f   : > { %s4433_s18 = smov (!%p659_p13, %s2429_s18), 63  ;;  %s4366_s23 = sld [smem:[#allocation40_spill]] }
  0x30   : > { %s2430_s15 = sshll.u32 %s4433_s18, 3  ;;  %s3354_s22 = scalar_lea.vmem [#allocation8], %s2427_s20 }
  0x31   : > { %s649_s14 = scalar_lea.vmem [#allocation10], %s3333_s2  ;;  %s4341_s13 = scalar_lea.vmem [#allocation12], %s3333_s2 }
  0x32   : > { %p2435_p0 = scmp.ne.s32.totalorder %s3132_s19, 0 }
  0x33   : > { %s670_s21 = scalar_lea.vmem %s4364_s24, %s4431_s29  ;;  %v689_v0 = vld [vmem:[%s4292_s8] sm:$0xff] (!%p2435_p0)  ;;  %v690_v1 = vld [vmem:[%s4292_s8 + $0x8] sm:$0xff] (!%p2435_p0)  ;;  %v691_v2 = vld [vmem:[%s4292_s8 + $0x10] sm:$0xff] (!%p2435_p0)  ;;  %v878_v3 = vlaneseq (!%p2435_p0)  ;;  %v3150_v4 = vmov (!%p2435_p0), 0.0|0.0   ;;  %vm3151_vm0 = vmmov (!%p2435_p0), 0   ;;  %v3152_v7 = vmov (!%p2435_p0), 0.0  }
  0x34   : > { %s3347_s16 = scalar_lea.vmem %s4365_s26, %s2430_s15  ;;  %687 = sbr.rel (%p2435_p0) target bundleno = 518 (0x206), region = 88  ;;  %2786 = vmatprep.subr.bf16.mxu0 (!%p2435_p0), %v3150_v4  ;;  %v2787_v5 = vpack.c.bf16 (!%p2435_p0), %v690_v1, %v689_v0  ;;  %v692_v6 = vld [vmem:[%s4292_s8 + $0x18] sm:$0xff] (!%p2435_p0)  ;;  %2628 = vmatprep.mubr.msk.f32.mxu0 (!%p2435_p0), %vm3151_vm0, %v3152_v7  ;;  %887 = vst [vmem:[#allocation4] sm:$0xff] (!%p2435_p0), %v3152_v7  ;;  %vm888_vm1 = vcmask (!%p2435_p0), 57344   ;;  %vm885_vm2 = vcmask (!%p2435_p0), 64512   ;;  %v693_v11 = vld [vmem:[%s4292_s8 + $0x20] sm:$0xff] (!%p2435_p0) }
  0x35   : > { %s3352_s1 = scalar_lea.vmem %s4366_s23, %s2430_s15  ;;  %v879_v8 = vshrl.u32 (!%p2435_p0), %v878_v3, 7  ;;  %v881_v9 = vand.u32 (!%p2435_p0), 127, %v878_v3  ;;  %890 = vst.msk [vmem:[#allocation6] sm:$0x1] (!%p2435_p0), %vm888_vm1, %v3152_v7  ;;  %2810 = vmatprep.subr.bf16.mxu1 (!%p2435_p0), %v3150_v4  ;;  %2663 = vmatprep.mubr.msk.f32.mxu1 (!%p2435_p0), %vm3151_vm0, %v3152_v7  ;;  %v2790_v10 = vpack.c.bf16 (!%p2435_p0), %v692_v6, %v691_v2  ;;  %v694_v12 = vld [vmem:[%s4292_s8 + $0x28] sm:$0xff] (!%p2435_p0)  ;;  %v783_v15 = vld [vmem:[%s4294_s10] sm:$0xff] (!%p2435_p0) }
  0x36   : > { %2788 = vmatpush3.bf16.msra.mxu0 (!%p2435_p0), %v2787_v5  ;;  %v3153_v13 = vmov (!%p2435_p0), -1e+30   ;;  %v784_v16 = vld [vmem:[%s4294_s10 + $0x8] sm:$0xff] (!%p2435_p0)  ;;  %v785_v17 = vld [vmem:[%s4294_s10 + $0x10] sm:$0xff] (!%p2435_p0)  ;;  %v786_v18 = vld [vmem:[%s4294_s10 + $0x18] sm:$0xff] (!%p2435_p0)  ;;  %v2793_v19 = vpack.c.bf16 (!%p2435_p0), %v694_v12, %v693_v11 }
  0x37   : > { %2789 = vmatprep.subr.bf16.mxu0 (!%p2435_p0), %v3150_v4  ;;  %vm882_vm3 = vcmp.eq.s32.totalorder (!%p2435_p0), %v879_v8, %v881_v9  ;;  %889 = vst.msk [vmem:[#allocation5] sm:$0x1] (!%p2435_p0), %vm888_vm1, %v3153_v13  ;;  %v2811_v20 = vpack.c.bf16 (!%p2435_p0), %v784_v16, %v783_v15  ;;  %v695_v21 = vld [vmem:[%s4292_s8 + $0x30] sm:$0xff] (!%p2435_p0)  ;;  %v696_v22 = vld [vmem:[%s4292_s8 + $0x38] sm:$0xff] (!%p2435_p0)  ;;  %v2814_v23 = vpack.c.bf16 (!%p2435_p0), %v786_v18, %v785_v17  ;;  %v787_v24 = vld [vmem:[%s4294_s10 + $0x20] sm:$0xff] (!%p2435_p0) }
  0x38   : > { %v2438_v14 = vsel (!%p2435_p0), %vm882_vm3, 1.0, %v3152_v7  ;;  %v788_v25 = vld [vmem:[%s4294_s10 + $0x28] sm:$0xff] (!%p2435_p0)  ;;  %v2796_v26 = vpack.c.bf16 (!%p2435_p0), %v696_v22, %v695_v21  ;;  %v697_v27 = vld [vmem:[%s4292_s8 + $0x40] sm:$0xff] (!%p2435_p0)  ;;  %v789_v30 = vld [vmem:[%s4294_s10 + $0x30] sm:$0xff] (!%p2435_p0) }
  0x39   : > { %886 = vst.msk [vmem:[#allocation3] sm:$0xff] (!%p2435_p0), %vm885_vm2, %v2438_v14  ;;  %2812 = vmatpush3.bf16.msra.mxu1 (!%p2435_p0), %v2811_v20  ;;  %v698_v28 = vld [vmem:[%s4292_s8 + $0x48] sm:$0xff] (!%p2435_p0)  ;;  %v2817_v29 = vpack.c.bf16 (!%p2435_p0), %v788_v25, %v787_v24  ;;  %v790_v31 = vld [vmem:[%s4294_s10 + $0x38] sm:$0xff] (!%p2435_p0)  ;;  %v699_v33 = vld [vmem:[%s4292_s8 + $0x50] sm:$0xff] (!%p2435_p0) }
  0x3a   : > { %2791 = vmatpush3.bf16.msra.mxu0 (!%p2435_p0), %v2790_v10  ;;  %2813 = vmatprep.subr.bf16.mxu1 (!%p2435_p0), %v3150_v4  ;;  %v2799_v32 = vpack.c.bf16 (!%p2435_p0), %v698_v28, %v697_v27  ;;  %v700_v34 = vld [vmem:[%s4292_s8 + $0x58] sm:$0xff] (!%p2435_p0)  ;;  %v2820_v35 = vpack.c.bf16 (!%p2435_p0), %v790_v31, %v789_v30  ;;  %v791_v36 = vld [vmem:[%s4294_s10 + $0x40] sm:$0xff] (!%p2435_p0)  ;;  %v792_v37 = vld [vmem:[%s4294_s10 + $0x48] sm:$0xff] (!%p2435_p0) }
  0x3b   : > { %2792 = vmatprep.subr.bf16.mxu0 %v3150_v4  ;;  %v2802_v38 = vpack.c.bf16 %v700_v34, %v699_v33  ;;  %v701_v39 = vld [vmem:[%s4292_s8 + $0x60] sm:$0xff]  ;;  %v702_v40 = vld [vmem:[%s4292_s8 + $0x68] sm:$0xff]  ;;  %v2823_v41 = vpack.c.bf16 %v792_v37, %v791_v36  ;;  %v793_v42 = vld [vmem:[%s4294_s10 + $0x50] sm:$0xff] }
  0x3c   : > { %v794_v43 = vld [vmem:[%s4294_s10 + $0x58] sm:$0xff]  ;;  %v2805_v44 = vpack.c.bf16 %v702_v40, %v701_v39  ;;  %v703_v45 = vld [vmem:[%s4292_s8 + $0x70] sm:$0xff]  ;;  %v795_v48 = vld [vmem:[%s4294_s10 + $0x60] sm:$0xff] }
  0x3d   : > { %2815 = vmatpush3.bf16.msra.mxu1 %v2814_v23  ;;  %v704_v46 = vld [vmem:[%s4292_s8 + $0x78] sm:$0xff]  ;;  %v2826_v47 = vpack.c.bf16 %v794_v43, %v793_v42  ;;  %v796_v49 = vld [vmem:[%s4294_s10 + $0x68] sm:$0xff]  ;;  %v688_v52 = vld [vmem:[%s4287_s3] sm:$0xff] }
  0x3e   : > { %2794 = vmatpush3.bf16.msra.mxu0 %v2793_v19  ;;  %2816 = vmatprep.subr.bf16.mxu1 %v3150_v4  ;;  %v2808_v50 = vpack.c.bf16 %v704_v46, %v703_v45  ;;  %v2829_v51 = vpack.c.bf16 %v796_v49, %v795_v48  ;;  %v797_v53 = vld [vmem:[%s4294_s10 + $0x70] sm:$0xff]  ;;  %v798_v54 = vld [vmem:[%s4294_s10 + $0x78] sm:$0xff]  ;;  %v2436_v56 = vld [vmem:[%s4293_s9] ss:$0 sm:$0xff] }
  0x3f   : > { %2795 = vmatprep.subr.bf16.mxu0 %v3150_v4  ;;  %v2832_v55 = vpack.c.bf16 %v798_v54, %v797_v53  ;;  %v2437_v61 = vld [vmem:[%s4295_s11] ss:$0 sm:$0xff] }
  0x41   : > { %2818 = vmatpush3.bf16.msra.mxu1 %v2817_v29 }
  0x42   : > { %2797 = vmatpush3.bf16.msra.mxu0 %v2796_v26  ;;  %2819 = vmatprep.subr.bf16.mxu1 %v3150_v4 }
  0x43   : > { %2798 = vmatprep.subr.bf16.mxu0 %v3150_v4 }
  0x45   : > { %2821 = vmatpush3.bf16.msra.mxu1 %v2820_v35 }
  0x46   : > { %2800 = vmatpush3.bf16.msra.mxu0 %v2799_v32  ;;  %2822 = vmatprep.subr.bf16.mxu1 %v3150_v4 }
  0x47   : > { %2801 = vmatprep.subr.bf16.mxu0 %v3150_v4 }
  0x49   : > { %2824 = vmatpush3.bf16.msra.mxu1 %v2823_v41 }
  0x4a   : > { %2803 = vmatpush3.bf16.msra.mxu0 %v2802_v38  ;;  %2825 = vmatprep.subr.bf16.mxu1 %v3150_v4 }
  0x4b   : > { %2804 = vmatprep.subr.bf16.mxu0 %v3150_v4 }
  0x4d   : > { %2827 = vmatpush3.bf16.msra.mxu1 %v2826_v47 }
  0x4e   : > { %2806 = vmatpush3.bf16.msra.mxu0 %v2805_v44  ;;  %2828 = vmatprep.subr.bf16.mxu1 %v3150_v4 }
  0x4f   : > { %2807 = vmatprep.subr.bf16.mxu0 %v3150_v4 }
  0x51   : > { %2830 = vmatpush3.bf16.msra.mxu1 %v2829_v51 }
  0x52   : > { %2809 = vmatpush3.bf16.msra.mxu0 %v2808_v50  ;;  %2831 = vmatprep.subr.bf16.mxu1 %v3150_v4 }
  0x55   : > { %2629 = vmatmul.mubr.f32.vlgmr.msra.gmra.mrb[0].mxu0 %v688_v52  ;;  %2833 = vmatpush3.bf16.msra.mxu1 %v2832_v55 }
 0x128   : > { %v778_v57 = vpop.f32.mrb[0].mxu0 }
 0x129   : > { %v779_v58 = vadd.f32 %v2436_v56, %v778_v57  ;;  %v2630_v59 = vpop.f32.mrb[1].mxu0 }
 0x12b   : > { %v782_v60 = vmax.f32 %v779_v58, 0.0 }
 0x12d   : > { %2664 = vmatmul.mubr.f32.vlgmr.msra.gmra.mrb[0].mxu1 %v782_v60 }
 0x200   : > { %v872_v62 = vpop.f32.mrb[0].mxu1 }
 0x201   : > { %v873_v63 = vadd.f32 %v2437_v61, %v872_v62  ;;  %v2665_v0 = vpop.f32.mrb[1].mxu1 }
 0x203   : > { %v876_v1 = vpack.c.bf16 %v873_v63, %v873_v63 }
 0x205   : > { %877 = vst [vmem:[#allocation2] sm:$0xf] %v876_v1 }
 0x206 PF: > { %v2927_v2 = vld [vmem:[%s4288_s4] sm:$0x3f]   ;;  %vm954_vm4 = vcmask 1045504   ;;  %v892_v4 = vld [vmem:[%s3352_s1 + $0x8] sm:$0xff]  ;;  %vm929_vm5 = vcmask 97280   ;;  %v893_v5 = vld [vmem:[%s3352_s1 + $0x10] sm:$0xff]  ;;  %v4324_v57 = vlaneseq }
 0x207   : > { %v891_v3 = vld [vmem:[%s3352_s1] sm:$0xff]  ;;  %2834 = vmatprep.subr.msk.bf16.mxu0 %vm954_vm4, %v2927_v2  ;;  %v956_v6 = vsel %vm954_vm4, %v2927_v2, 0  ;;  %v894_v8 = vld [vmem:[%s3352_s1 + $0x18] sm:$0xff]  ;;  %v896_v10 = vld [vmem:[%s3352_s1 + $0x28] sm:$0xff]  ;;  %v3154_v11 = vmov 0   ;;  %vm1419_vm6 = vcmask 1043456  }
 0x208   : > { %v907_v7 = vpack.c.bf16 %v892_v4, %v891_v3  ;;  %v895_v9 = vld [vmem:[%s3352_s1 + $0x20] sm:$0xff]  ;;  %2925 = vset.pattern.permute.xlu0 %v3154_v11  ;;  %2667 = vmatpush3.bf16.msra.mxu0 %v956_v6  ;;  %v908_v12 = vpack.c.bf16 %v894_v8, %v893_v5  ;;  %v1249_v15 = vld [vmem:[%s3347_s16 + $0x10] sm:$0xff]  ;;  %v898_v17 = vld [vmem:[%s3352_s1 + $0x38] sm:$0xff]  ;;  %v4322_v38 = vmov 0.0   ;;  %v3555_v58 = vand.u32 127, %v4324_v57  ;;  %s4378_s23 = sld [smem:[#allocation41_spill]] }
 0x209   : > { %v909_v13 = vpack.c.bf16 %v896_v10, %v895_v9  ;;  %2926 = vset.pattern.permute.xlu1 %v3154_v11  ;;  %v1247_v14 = vld [vmem:[%s3347_s16] sm:$0xff]  ;;  %v897_v16 = vld [vmem:[%s3352_s1 + $0x30] sm:$0xff]  ;;  %v900_v19 = vld [vmem:[%s3352_s1 + $0x48] sm:$0xff]  ;;  %vm1394_vm11 = vcmask 64512   ;;  %s4379_s18 = sld [smem:[#allocation42_spill]]  ;;  %s1783_s30 = sld [smem:[#allocation7]] }
 0x20a   : > { %2668 = vmatprep.mubr.msk.bf16.mxu0 %vm929_vm5, %v907_v7  ;;  %1267 = vperm.xlu0 %2925, %v1247_v14   ;;  %v899_v18 = vld [vmem:[%s3352_s1 + $0x40] sm:$0xff]  ;;  %v1248_v20 = vld [vmem:[%s3347_s16 + $0x8] sm:$0xff]  ;;  %v1250_v21 = vld [vmem:[%s3347_s16 + $0x18] sm:$0xff]  ;;  %v910_v22 = vpack.c.bf16 %v898_v17, %v897_v16  ;;  %p2496_p1 = scmp.ne.s32.totalorder %s3132_s19, 1 }
 0x20b   : > { %2669 = vmatmul.mubr.msk.bf16.vlgmr.msra.gmra.mrb[0].mxu0 %vm929_vm5, %v908_v12  ;;  %1273 = vperm.xlu1 %2926, %v1249_v15   ;;  %v911_v23 = vpack.c.bf16 %v900_v19, %v899_v18  ;;  %v1252_v24 = vld [vmem:[%s3347_s16 + $0x28] sm:$0xff]  ;;  %v1251_v25 = vld [vmem:[%s3347_s16 + $0x20] sm:$0xff]  ;;  %v901_v26 = vld [vmem:[%s3352_s1 + $0x50] sm:$0xff] }
 0x20c   : > { %2672 = vmatprep.mubr.msk.bf16.mxu0 %vm929_vm5, %v909_v13  ;;  %v902_v27 = vld [vmem:[%s3352_s1 + $0x58] sm:$0xff]  ;;  %v903_v28 = vld [vmem:[%s3352_s1 + $0x60] sm:$0xff]  ;;  %v904_v29 = vld [vmem:[%s3352_s1 + $0x68] sm:$0xff] }
 0x20d   : > { %v1393_v30 = vld [vmem:[#allocation2] sm:$0xf]  ;;  %v1254_v32 = vld [vmem:[%s3347_s16 + $0x38] sm:$0xff]  ;;  %v1253_v33 = vld [vmem:[%s3347_s16 + $0x30] sm:$0xff]  ;;  %v912_v35 = vpack.c.bf16 %v902_v27, %v901_v26  ;;  %v913_v39 = vpack.c.bf16 %v904_v29, %v903_v28 }
 0x20e   : > { %1270 = vperm.xlu0 %2925, %v1248_v20   ;;  %v2928_v31 = vld [vmem:[%s4290_s6] sm:$0xff]   ;;  %v1421_v34 = vsel %vm1419_vm6, %v1393_v30, 0  ;;  %2835 = vmatprep.subr.msk.bf16.mxu0 %vm1419_vm6, %v1393_v30  ;;  %v2929_v37 = vld [vmem:[%s4290_s6 + $0x8] sm:$0xff]   ;;  %v905_v41 = vld [vmem:[%s3352_s1 + $0x70] sm:$0xff] }
 0x20f   : > { %1276 = vperm.xlu1 %2926, %v1250_v21   ;;  %2717 = vmatpush3.bf16.msra.mxu0 %v1421_v34  ;;  %v1255_v36 = vld [vmem:[%s3347_s16 + $0x40] sm:$0xff]  ;;  %v1256_v40 = vld [vmem:[%s3347_s16 + $0x48] sm:$0xff]  ;;  %v906_v42 = vld [vmem:[%s3352_s1 + $0x78] sm:$0xff] }
 0x210   : > { %2684 = vmatprep.subr.bf16.mxu1 %v2928_v31  ;;  %2766 = vmatprep.subr.bf16.mxu0 %v4322_v38  ;;  %v2930_v43 = vld [vmem:[%s4290_s6 + $0x10] sm:$0xff]   ;;  %v1258_v45 = vld [vmem:[%s3347_s16 + $0x58] sm:$0xff]  ;;  %v914_v46 = vpack.c.bf16 %v906_v42, %v905_v41  ;;  %v1259_v48 = vld [vmem:[%s3347_s16 + $0x60] sm:$0xff] }
 0x211   : > { %2685 = vmatpush3.bf16.msra.mxu1 %v2928_v31  ;;  %v1257_v44 = vld [vmem:[%s3347_s16 + $0x50] sm:$0xff]  ;;  %v2931_v47 = vld [vmem:[%s4290_s6 + $0x18] sm:$0xff]   ;;  %v1260_v49 = vld [vmem:[%s3347_s16 + $0x68] sm:$0xff] }
 0x212   : > { %1279 = vperm.xlu0 %2925, %v1251_v25   ;;  %2686 = vmatprep.subr.bf16.mxu1 %v2929_v37  ;;  %v2932_v50 = vld [vmem:[%s4290_s6 + $0x20] sm:$0xff]   ;;  %v1261_v51 = vld [vmem:[%s3347_s16 + $0x70] sm:$0xff]  ;;  %v1262_v52 = vld [vmem:[%s3347_s16 + $0x78] sm:$0xff] }
 0x213   : > { %2673 = vmatmul.mubr.msk.bf16.gmra.mrb[4].mxu0 %vm929_vm5, %v910_v22  ;;  %1282 = vperm.xlu1 %2926, %v1252_v24   ;;  %v2933_v53 = vld [vmem:[%s4290_s6 + $0x28] sm:$0xff]   ;;  %v2934_v54 = vld [vmem:[%s4290_s6 + $0x30] sm:$0xff]   ;;  %v2935_v55 = vld [vmem:[%s4290_s6 + $0x38] sm:$0xff]  }
 0x214   : > { %2676 = vmatprep.mubr.msk.bf16.mxu0 %vm929_vm5, %v911_v23  ;;  %v3551_v56 = vld [vmem:[%s4296_s12] sm:$0xff]  }
 0x215   : > { %2687 = vmatpush3.bf16.msra.mxu1 %v2929_v37 }
 0x216   : > { %1285 = vperm.xlu0 %2925, %v1253_v33   ;;  %2688 = vmatprep.subr.bf16.mxu1 %v2930_v43 }
 0x217   : > { %1288 = vperm.xlu1 %2926, %v1254_v32  }
 0x219   : > { %2689 = vmatpush3.bf16.msra.mxu1 %v2930_v43 }
 0x21a   : > { %1291 = vperm.xlu0 %2925, %v1255_v36   ;;  %2690 = vmatprep.subr.bf16.mxu1 %v2931_v47 }
 0x21b   : > { %2677 = vmatmul.mubr.msk.bf16.gmra.mrb[8].mxu0 %vm929_vm5, %v912_v35  ;;  %1294 = vperm.xlu1 %2926, %v1256_v40   ;;  %v3696_v35 = vld [vmem:[%s4289_s5] ss:$0 sm:$0xff] }
 0x21c   : > { %2680 = vmatprep.mubr.msk.bf16.mxu0 %vm929_vm5, %v913_v39 }
 0x21d   : > { %2691 = vmatpush3.bf16.msra.mxu1 %v2931_v47 }
 0x21e   : > { %1297 = vperm.xlu0 %2925, %v1257_v44   ;;  %2692 = vmatprep.subr.bf16.mxu1 %v2932_v50 }
 0x21f   : > { %1300 = vperm.xlu1 %2926, %v1258_v45  }
 0x221   : > { %2693 = vmatpush3.bf16.msra.mxu1 %v2932_v50 }
 0x222   : > { %1303 = vperm.xlu0 %2925, %v1259_v48   ;;  %2694 = vmatprep.subr.bf16.mxu1 %v2933_v53 }
 0x223   : > { %2681 = vmatmul.mubr.msk.bf16.gmra.mrb[12].mxu0 %vm929_vm5, %v914_v46  ;;  %1306 = vperm.xlu1 %2926, %v1260_v49  }
 0x225   : > { %2695 = vmatpush3.bf16.msra.mxu1 %v2933_v53 }
 0x226   : > { %1309 = vperm.xlu0 %2925, %v1261_v51   ;;  %2696 = vmatprep.subr.bf16.mxu1 %v2934_v54 }
 0x227   : > { %1312 = vperm.xlu1 %2926, %v1262_v52  }
 0x229   : > { %2697 = vmatpush3.bf16.msra.mxu1 %v2934_v54 }
 0x22a   : > { %2698 = vmatprep.subr.bf16.mxu1 %v2935_v55 }
 0x22d   : > { %2699 = vmatpush3.bf16.msra.mxu1 %v2935_v55 }
 0x22e   : > { %2734 = vmatprep.subr.bf16.mxu1 %v3551_v56 }
 0x289   : > { %v3557_v59 = vpop.permute.xlu0 %1267 }
 0x28a   : > { %vm1314_vm7 = vcmp.eq.s32.totalorder %v3555_v58, %v3557_v59  ;;  %v3561_v60 = vpop.permute.xlu1 %1273 }
 0x28b   : > { %vm1316_vm8 = vcmp.eq.s32.totalorder %v3555_v58, %v3561_v60  ;;  %v2459_v61 = vsel %vm1314_vm7, 1.0, %v4322_v38 }
 0x28c   : > { %v2461_v63 = vsel %vm1316_vm8, 1.0, %v4322_v38 }
 0x28d   : > { %v3569_v62 = vpop.permute.xlu0 %1270 }
 0x28e   : > { %vm1315_vm9 = vcmp.eq.s32.totalorder %v3555_v58, %v3569_v62  ;;  %v3577_v0 = vpop.permute.xlu1 %1276 }
 0x28f   : > { %v2460_v1 = vsel %vm1315_vm9, 1.0, %v4322_v38  ;;  %vm1317_vm10 = vcmp.eq.s32.totalorder %v3555_v58, %v3577_v0 }
 0x290   : > { %v1385_v2 = vpack.c.bf16 %v2460_v1, %v2459_v61  ;;  %v2462_v3 = vsel %vm1317_vm10, 1.0, %v4322_v38 }
 0x291   : > { %v1386_v4 = vpack.c.bf16 %v2462_v3, %v2461_v63  ;;  %v3589_v5 = vpop.permute.xlu0 %1279 }
 0x292   : > { %v3591_v6 = vpop.permute.xlu1 %1282  ;;  %vm1318_vm12 = vcmp.eq.s32.totalorder %v3555_v58, %v3589_v5  ;;  %2718 = vmatprep.mubr.msk.bf16.mxu0 %vm1394_vm11, %v1385_v2  ;;  %v2937_v2 = vld [vmem:[%s4296_s12 + $0x8] sm:$0xff]  }
 0x293   : > { %vm1319_vm13 = vcmp.eq.s32.totalorder %v3555_v58, %v3591_v6  ;;  %v2463_v7 = vsel %vm1318_vm12, 1.0, %v4322_v38  ;;  %2719 = vmatmul.mubr.msk.bf16.vlgmr.msra.gmra.mrb[16].mxu0 %vm1394_vm11, %v1386_v4 }
 0x294   : > { %v2464_v8 = vsel %vm1319_vm13, 1.0, %v4322_v38 }
 0x295   : > { %v1387_v9 = vpack.c.bf16 %v2464_v8, %v2463_v7  ;;  %v3607_v10 = vpop.permute.xlu0 %1285 }
 0x296   : > { %v3609_v11 = vpop.permute.xlu1 %1288  ;;  %vm1320_vm14 = vcmp.eq.s32.totalorder %v3555_v58, %v3607_v10 }
 0x297   : > { %vm4338_vm15 = vcmp.eq.s32.totalorder %v3555_v58, %v3609_v11  ;;  %v2465_v12 = vsel %vm1320_vm14, 1.0, %v4322_v38  ;;  %2722 = vmatprep.mubr.msk.bf16.mxu0 %vm1394_vm11, %v1387_v9 }
 0x298   : > { %v2466_v13 = vsel %vm4338_vm15, 1.0, %v4322_v38 }
 0x299   : > { %v1388_v14 = vpack.c.bf16 %v2466_v13, %v2465_v12  ;;  %v3624_v15 = vpop.permute.xlu0 %1291 }
 0x29a   : > { %v3626_v16 = vpop.permute.xlu1 %1294  ;;  %vm1322_vm0 = vcmp.eq.s32.totalorder %v3555_v58, %v3624_v15 }
 0x29b   : > { %vm4325_vm1 = vcmp.eq.s32.totalorder %v3555_v58, %v3626_v16  ;;  %v2467_v17 = vsel %vm1322_vm0, 1.0, %v4322_v38  ;;  %2723 = vmatmul.mubr.msk.bf16.gmra.mrb[20].mxu0 %vm1394_vm11, %v1388_v14 }
 0x29c   : > { %v2468_v18 = vsel %vm4325_vm1, 1.0, %v4322_v38 }
 0x29d   : > { %v1389_v19 = vpack.c.bf16 %v2468_v18, %v2467_v17  ;;  %v3641_v20 = vpop.permute.xlu0 %1297 }
 0x29e   : > { %v3643_v21 = vpop.permute.xlu1 %1300  ;;  %vm1324_vm2 = vcmp.eq.s32.totalorder %v3555_v58, %v3641_v20 }
 0x29f   : > { %vm4321_vm3 = vcmp.eq.s32.totalorder %v3555_v58, %v3643_v21  ;;  %v2469_v22 = vsel %vm1324_vm2, 1.0, %v4322_v38  ;;  %2726 = vmatprep.mubr.msk.bf16.mxu0 %vm1394_vm11, %v1389_v19 }
 0x2a0   : > { %v2470_v23 = vsel %vm4321_vm3, 1.0, %v4322_v38 }
 0x2a1   : > { %v1390_v24 = vpack.c.bf16 %v2470_v23, %v2469_v22  ;;  %v3658_v25 = vpop.permute.xlu0 %1303 }
 0x2a2   : > { %v3660_v26 = vpop.permute.xlu1 %1306  ;;  %vm1326_vm4 = vcmp.eq.s32.totalorder %v3555_v58, %v3658_v25 }
 0x2a3   : > { %vm4340_vm5 = vcmp.eq.s32.totalorder %v3555_v58, %v3660_v26  ;;  %v2471_v27 = vsel %vm1326_vm4, 1.0, %v4322_v38  ;;  %2727 = vmatmul.mubr.msk.bf16.gmra.mrb[24].mxu0 %vm1394_vm11, %v1390_v24 }
 0x2a4   : > { %v2472_v28 = vsel %vm4340_vm5, 1.0, %v4322_v38 }
 0x2a5   : > { %v1391_v29 = vpack.c.bf16 %v2472_v28, %v2471_v27  ;;  %v3675_v30 = vpop.permute.xlu0 %1309 }
 0x2a6   : > { %v3677_v31 = vpop.permute.xlu1 %1312  ;;  %vm1328_vm6 = vcmp.eq.s32.totalorder %v3555_v58, %v3675_v30 }
 0x2a7   : > { %vm4339_vm3 = vcmp.eq.s32.totalorder %v3555_v58, %v3677_v31  ;;  %v2473_v32 = vsel %vm1328_vm6, 1.0, %v4322_v38  ;;  %2730 = vmatprep.mubr.msk.bf16.mxu0 %vm1394_vm11, %v1391_v29 }
 0x2a8   : > { %v2474_v33 = vsel %vm4339_vm3, 1.0, %v4322_v38 }
 0x2a9   : > { %v1392_v34 = vpack.c.bf16 %v2474_v33, %v2473_v32 }
 0x2ab   : > { %2731 = vmatmul.mubr.msk.bf16.gmra.mrb[28].mxu0 %vm1394_vm11, %v1392_v34 }
 0x2de   : > { %v2670_v36 = vpop.f32.mrb[0].mxu0 }
 0x2df   : > { %v1001_v37 = vadd.f32 %v2670_v36, %v3696_v35  ;;  %v992_v39 = vpop.f32.mrb[1].mxu0 }
 0x2e0   : > { %v993_v40 = vadd.f32 %v3696_v35, %v992_v39  ;;  %v2671_v41 = vpop.f32.mrb[2].mxu0 }
 0x2e1   : > { %v1004_v42 = vadd.f32 %v2671_v41, %v3696_v35  ;;  %v995_v43 = vpop.f32.mrb[3].mxu0  ;;  %v1057_v45 = vmax.f32 %v1001_v37, 0.0 }
 0x2e2   : > { %v996_v44 = vadd.f32 %v3696_v35, %v995_v43  ;;  %v1055_v47 = vmax.f32 %v993_v40, 0.0 }
 0x2e3   : > { %v1058_v46 = vmax.f32 %v1004_v42, 0.0 }
 0x2e4   : > { %v1056_v48 = vmax.f32 %v996_v44, 0.0 }
 0x2e5   : > { %v1072_v49 = vpack.c.bf16 %v1058_v46, %v1057_v45  ;;  %v2939_v45 = vld [vmem:[%s4296_s12 + $0x18] sm:$0xff]  }
 0x2e6   : > { %v2674_v50 = vpop.f32.mrb[4].mxu0  ;;  %v1071_v51 = vpack.c.bf16 %v1056_v48, %v1055_v47 }
 0x2e7   : > { %v1017_v52 = vadd.f32 %v2674_v50, %v3696_v35  ;;  %v1008_v53 = vpop.f32.mrb[5].mxu0 }
 0x2e8   : > { %v1009_v54 = vadd.f32 %v3696_v35, %v1008_v53  ;;  %v2675_v55 = vpop.f32.mrb[6].mxu0  ;;  %2700 = vmatprep.mubr.bf16.mxu1 %v1071_v51  ;;  %v2941_v53 = vld [vmem:[%s4296_s12 + $0x28] sm:$0xff]  }
 0x2e9   : > { %v1061_v61 = vmax.f32 %v1017_v52, 0.0  ;;  %v1020_v63 = vadd.f32 %v2675_v55, %v3696_v35  ;;  %v1011_v1 = vpop.f32.mrb[7].mxu0  ;;  %2701 = vmatmul.mubr.bf16.vlgmr.msra.gmra.mrb[0].mxu1 %v1072_v49  ;;  %v2940_v52 = vld [vmem:[%s4296_s12 + $0x20] sm:$0xff]  }
 0x2ea   : > { %v1012_v3 = vadd.f32 %v3696_v35, %v1011_v1  ;;  %2735 = vmatpush3.bf16.msra.mxu1 %v3551_v56  ;;  %v1059_v7 = vmax.f32 %v1009_v54, 0.0  ;;  %v2938_v56 = vld [vmem:[%s4296_s12 + $0x10] sm:$0xff]   ;;  %v2943_v54 = vld [vmem:[%s4296_s12 + $0x38] sm:$0xff]  }
 0x2eb   : > { %v1062_v4 = vmax.f32 %v1020_v63, 0.0  ;;  %2736 = vmatprep.subr.bf16.mxu1 %v2937_v2 }
 0x2ec   : > { %v1060_v8 = vmax.f32 %v1012_v3, 0.0 }
 0x2ed   : > { %v1074_v9 = vpack.c.bf16 %v1062_v4, %v1061_v61 }
 0x2ee   : > { %v1073_v12 = vpack.c.bf16 %v1060_v8, %v1059_v7  ;;  %v2678_v13 = vpop.f32.mrb[8].mxu0  ;;  %2737 = vmatpush3.bf16.msra.mxu1 %v2937_v2 }
 0x2ef   : > { %v1033_v14 = vadd.f32 %v2678_v13, %v3696_v35  ;;  %v1024_v17 = vpop.f32.mrb[9].mxu0  ;;  %2738 = vmatprep.subr.bf16.mxu1 %v2938_v56 }
 0x2f0   : > { %v1025_v18 = vadd.f32 %v3696_v35, %v1024_v17  ;;  %v2679_v19 = vpop.f32.mrb[10].mxu0  ;;  %2704 = vmatprep.mubr.bf16.mxu1 %v1073_v12 }
 0x2f1   : > { %v1065_v22 = vmax.f32 %v1033_v14, 0.0  ;;  %v1036_v23 = vadd.f32 %v2679_v19, %v3696_v35  ;;  %v1027_v24 = vpop.f32.mrb[11].mxu0  ;;  %2705 = vmatmul.mubr.bf16.gmra.mrb[4].mxu1 %v1074_v9 }
 0x2f2   : > { %v1028_v27 = vadd.f32 %v3696_v35, %v1027_v24  ;;  %v1063_v29 = vmax.f32 %v1025_v18, 0.0  ;;  %2739 = vmatpush3.bf16.msra.mxu1 %v2938_v56 }
 0x2f3   : > { %v1066_v28 = vmax.f32 %v1036_v23, 0.0  ;;  %2740 = vmatprep.subr.bf16.mxu1 %v2939_v45 }
 0x2f4   : > { %v1064_v32 = vmax.f32 %v1028_v27, 0.0 }
 0x2f5   : > { %v1076_v33 = vpack.c.bf16 %v1066_v28, %v1065_v22  ;;  %v2449_v22 = vld [vmem:[%s4291_s7] ss:$0 sm:$0xff] }
 0x2f6   : > { %v1075_v34 = vpack.c.bf16 %v1064_v32, %v1063_v29  ;;  %v2682_v36 = vpop.f32.mrb[12].mxu0  ;;  %2741 = vmatpush3.bf16.msra.mxu1 %v2939_v45 }
 0x2f7   : > { %v1049_v37 = vadd.f32 %v2682_v36, %v3696_v35  ;;  %v1040_v39 = vpop.f32.mrb[13].mxu0  ;;  %2742 = vmatprep.subr.bf16.mxu1 %v2940_v52 }
 0x2f8   : > { %v1041_v40 = vadd.f32 %v3696_v35, %v1040_v39  ;;  %v2683_v41 = vpop.f32.mrb[14].mxu0  ;;  %2708 = vmatprep.mubr.bf16.mxu1 %v1075_v34 }
 0x2f9   : > { %v1069_v42 = vmax.f32 %v1049_v37, 0.0  ;;  %v1052_v43 = vadd.f32 %v2683_v41, %v3696_v35  ;;  %v1043_v44 = vpop.f32.mrb[15].mxu0  ;;  %2709 = vmatmul.mubr.bf16.gmra.mrb[8].mxu1 %v1076_v33 }
 0x2fa   : > { %v1044_v46 = vadd.f32 %v3696_v35, %v1043_v44  ;;  %v1067_v48 = vmax.f32 %v1041_v40, 0.0  ;;  %2743 = vmatpush3.bf16.msra.mxu1 %v2940_v52  ;;  %v2942_v35 = vld [vmem:[%s4296_s12 + $0x30] sm:$0xff]  }
 0x2fb   : > { %v1070_v47 = vmax.f32 %v1052_v43, 0.0  ;;  %2744 = vmatprep.subr.bf16.mxu1 %v2941_v53 }
 0x2fc   : > { %v1068_v49 = vmax.f32 %v1044_v46, 0.0 }
 0x2fd   : > { %v1078_v50 = vpack.c.bf16 %v1070_v47, %v1069_v42 }
 0x2fe   : > { %v1077_v51 = vpack.c.bf16 %v1068_v49, %v1067_v48  ;;  %2745 = vmatpush3.bf16.msra.mxu1 %v2941_v53 }
 0x2ff   : > { %2746 = vmatprep.subr.bf16.mxu1 %v2942_v35 }
 0x300   : > { %2712 = vmatprep.mubr.bf16.mxu1 %v1077_v51 }
 0x301   : > { %2713 = vmatmul.mubr.bf16.gmra.mrb[12].mxu1 %v1078_v50 }
 0x302   : > { %2747 = vmatpush3.bf16.msra.mxu1 %v2942_v35 }
 0x303   : > { %2748 = vmatprep.subr.bf16.mxu1 %v2943_v54 }
 0x306   : > { %2749 = vmatpush3.bf16.msra.mxu1 %v2943_v54 }
 0x366   : > { %v2720_v55 = vpop.f32.mrb[16].mxu0 }
 0x367   : > { %v1457_v61 = vpop.f32.mrb[17].mxu0 }
 0x368   : > { %v2721_v63 = vpop.f32.mrb[18].mxu0 }
 0x369   : > { %v1460_v1 = vpop.f32.mrb[19].mxu0 }
 0x36e   : > { %v2724_v2 = vpop.f32.mrb[20].mxu0 }
 0x36f   : > { %v1473_v3 = vpop.f32.mrb[21].mxu0 }
 0x370   : > { %v2725_v4 = vpop.f32.mrb[22].mxu0 }
 0x371   : > { %v1476_v7 = vpop.f32.mrb[23].mxu0 }
 0x376   : > { %v2728_v8 = vpop.f32.mrb[24].mxu0 }
 0x377   : > { %v1489_v9 = vpop.f32.mrb[25].mxu0 }
 0x378   : > { %v2729_v12 = vpop.f32.mrb[26].mxu0 }
 0x379   : > { %v1492_v13 = vpop.f32.mrb[27].mxu0 }
 0x37e   : > { %v2732_v14 = vpop.f32.mrb[28].mxu0 }
 0x37f   : > { %v1505_v17 = vpop.f32.mrb[29].mxu0 }
 0x380   : > { %v2733_v18 = vpop.f32.mrb[30].mxu0 }
 0x381   : > { %v1508_v19 = vpop.f32.mrb[31].mxu0 }
 0x3bc   : > { %v2702_v23 = vpop.f32.mrb[0].mxu1 }
 0x3bd   : > { %v3739_v24 = vadd.f32 %v2702_v23, %v2449_v22  ;;  %v1184_v56 = vpop.f32.mrb[1].mxu1 }
 0x3be   : > { %v3741_v27 = vadd.f32 %v2449_v22, %v1184_v56  ;;  %v2703_v28 = vpop.f32.mrb[2].mxu1 }
 0x3bf   : > { %v3743_v29 = vadd.f32 %v2703_v28, %v2449_v22  ;;  %v1187_v32 = vpop.f32.mrb[3].mxu1  ;;  %v1522_v34 = vmul.f32 %v2720_v55, %v3739_v24 }
 0x3c0   : > { %v3745_v33 = vadd.f32 %v2449_v22, %v1187_v32  ;;  %v1520_v37 = vmul.f32 %v1457_v61, %v3741_v27 }
 0x3c1   : > { %v1523_v36 = vmul.f32 %v2721_v63, %v3743_v29 }
 0x3c2   : > { %v1521_v39 = vmul.f32 %v1460_v1, %v3745_v33 }
 0x3c3   : > { %v1537_v40 = vpack.c.bf16 %v1523_v36, %v1522_v34 }
 0x3c4   : > { %v2706_v41 = vpop.f32.mrb[4].mxu1  ;;  %v1536_v42 = vpack.c.bf16 %v1521_v39, %v1520_v37 }
 0x3c5   : > { %v3751_v43 = vadd.f32 %v2706_v41, %v2449_v22  ;;  %v1200_v44 = vpop.f32.mrb[5].mxu1 }
 0x3c6   : > { %v3753_v45 = vadd.f32 %v2449_v22, %v1200_v44  ;;  %v2707_v46 = vpop.f32.mrb[6].mxu1  ;;  %2750 = vmatprep.mubr.bf16.mxu1 %v1536_v42 }
 0x3c7   : > { %4367 = vst [vmem:[#allocation27_spill] sm:$0xff] %v3751_v43  ;;  %v3755_v47 = vadd.f32 %v2707_v46, %v2449_v22  ;;  %v1203_v48 = vpop.f32.mrb[7].mxu1  ;;  %2751 = vmatmul.mubr.bf16.vlgmr.msra.gmra.mrb[16].mxu1 %v1537_v40  ;;  %v1526_v50 = vmul.f32 %v2724_v2, %v3751_v43 }
 0x3c8   : > { %v3757_v49 = vadd.f32 %v2449_v22, %v1203_v48  ;;  %v1524_v52 = vmul.f32 %v1473_v3, %v3753_v45 }
 0x3c9   : > { %4368 = vst [vmem:[#allocation28_spill] sm:$0xff] %v3755_v47  ;;  %v1527_v51 = vmul.f32 %v2725_v4, %v3755_v47 }
 0x3ca   : > { %4369 = vst [vmem:[#allocation29_spill] sm:$0xff] %v3757_v49  ;;  %v1525_v53 = vmul.f32 %v1476_v7, %v3757_v49 }
 0x3cb   : > { %v1539_v35 = vpack.c.bf16 %v1527_v51, %v1526_v50 }
 0x3cc   : > { %v2710_v54 = vpop.f32.mrb[8].mxu1  ;;  %v1538_v55 = vpack.c.bf16 %v1525_v53, %v1524_v52  ;;  %v3790_v52 = vld [vmem:[%s4378_s23] ss:$0 sm:$0xff] }
 0x3cd   : > { %v3763_v61 = vadd.f32 %v2710_v54, %v2449_v22  ;;  %v1216_v63 = vpop.f32.mrb[9].mxu1 }
 0x3ce   : > { %v3765_v1 = vadd.f32 %v2449_v22, %v1216_v63  ;;  %v2711_v23 = vpop.f32.mrb[10].mxu1  ;;  %2754 = vmatprep.mubr.bf16.mxu1 %v1538_v55 }
 0x3cf   : > { %4370 = vst [vmem:[#allocation30_spill] sm:$0xff] %v3763_v61  ;;  %v3767_v56 = vadd.f32 %v2711_v23, %v2449_v22  ;;  %v1219_v28 = vpop.f32.mrb[11].mxu1  ;;  %2755 = vmatmul.mubr.bf16.gmra.mrb[20].mxu1 %v1539_v35  ;;  %v1530_v3 = vmul.f32 %v2728_v8, %v3763_v61 }
 0x3d0   : > { %4371 = vst [vmem:[#allocation31_spill] sm:$0xff] %v3765_v1  ;;  %v3769_v2 = vadd.f32 %v2449_v22, %v1219_v28  ;;  %v1528_v7 = vmul.f32 %v1489_v9, %v3765_v1 }
 0x3d1   : > { %4372 = vst [vmem:[#allocation32_spill] sm:$0xff] %v3767_v56  ;;  %v1531_v4 = vmul.f32 %v2729_v12, %v3767_v56 }
 0x3d2   : > { %4373 = vst [vmem:[#allocation33_spill] sm:$0xff] %v3769_v2  ;;  %v1529_v32 = vmul.f32 %v1492_v13, %v3769_v2 }
 0x3d3   : > { %v1541_v34 = vpack.c.bf16 %v1531_v4, %v1530_v3 }
 0x3d4   : > { %v2714_v36 = vpop.f32.mrb[12].mxu1  ;;  %v1540_v37 = vpack.c.bf16 %v1529_v32, %v1528_v7 }
 0x3d5   : > { %v3775_v39 = vadd.f32 %v2714_v36, %v2449_v22  ;;  %v1232_v40 = vpop.f32.mrb[13].mxu1 }
 0x3d6   : > { %v3777_v41 = vadd.f32 %v2449_v22, %v1232_v40  ;;  %v2715_v42 = vpop.f32.mrb[14].mxu1  ;;  %2758 = vmatprep.mubr.bf16.mxu1 %v1540_v37 }
 0x3d7   : > { %4374 = vst [vmem:[#allocation34_spill] sm:$0xff] %v3775_v39  ;;  %v3779_v44 = vadd.f32 %v2715_v42, %v2449_v22  ;;  %v1235_v46 = vpop.f32.mrb[15].mxu1  ;;  %2759 = vmatmul.mubr.bf16.gmra.mrb[24].mxu1 %v1541_v34  ;;  %v1534_v9 = vmul.f32 %v2732_v14, %v3775_v39 }
 0x3d8   : > { %4375 = vst [vmem:[#allocation35_spill] sm:$0xff] %v3777_v41  ;;  %v3781_v8 = vadd.f32 %v2449_v22, %v1235_v46  ;;  %v1532_v13 = vmul.f32 %v1505_v17, %v3777_v41  ;;  %v3797_v17 = vld [vmem:[%s4379_s18] ss:$0 sm:$0xff] }
 0x3d9   : > { %4376 = vst [vmem:[#allocation36_spill] sm:$0xff] %v3779_v44  ;;  %v1535_v12 = vmul.f32 %v2733_v18, %v3779_v44 }
 0x3da   : > { %4377 = vst [vmem:[#allocation37_spill] sm:$0xff] %v3781_v8  ;;  %v1533_v48 = vmul.f32 %v1508_v19, %v3781_v8 }
 0x3db   : > { %v1543_v50 = vpack.c.bf16 %v1535_v12, %v1534_v9 }
 0x3dc   : > { %v1542_v51 = vpack.c.bf16 %v1533_v48, %v1532_v13 }
 0x3de   : > { %2762 = vmatprep.mubr.bf16.mxu1 %v1542_v51 }
 0x3df   : > { %2763 = vmatmul.mubr.bf16.gmra.mrb[28].mxu1 %v1543_v50 }
 0x49a   : > { %v2752_v53 = vpop.f32.mrb[16].mxu1 }
 0x49b   : > { %v1658_v22 = vadd.f32 %v2752_v53, %v3790_v52  ;;  %v1649_v35 = vpop.f32.mrb[17].mxu1 }
 0x49c   : > { %v1650_v14 = vadd.f32 %v3790_v52, %v1649_v35  ;;  %v2753_v18 = vpop.f32.mrb[18].mxu1 }
 0x49d   : > { %v1714_v19 = vmax.f32 %v1658_v22, 0.0  ;;  %v1652_v54 = vpop.f32.mrb[19].mxu1  ;;  %v1661_v23 = vadd.f32 %v2753_v18, %v3790_v52 }
 0x49e   : > { %v1653_v55 = vadd.f32 %v3790_v52, %v1652_v54  ;;  %v1712_v63 = vmax.f32 %v1650_v14, 0.0 }
 0x49f   : > { %v1737_v28 = vmul.f32 %v3797_v17, %v1714_v19  ;;  %v1715_v32 = vmax.f32 %v1661_v23, 0.0 }
 0x4a0   : > { %v1713_v3 = vmax.f32 %v1653_v55, 0.0  ;;  %v1735_v37 = vmul.f32 %v3797_v17, %v1712_v63 }
 0x4a1   : > { %1755 = vadd.xlane.f32.xlu0 %v1737_v28  ;;  %v1738_v53 = vmul.f32 %v3797_v17, %v1715_v32 }
 0x4a2   : > { %v2756_v4 = vpop.f32.mrb[20].mxu1  ;;  %v1736_v7 = vmul.f32 %v3797_v17, %v1713_v3 }
 0x4a3   : > { %v1674_v34 = vadd.f32 %v2756_v4, %v3790_v52  ;;  %v1665_v36 = vpop.f32.mrb[21].mxu1 }
 0x4a4   : > { %v1666_v40 = vadd.f32 %v3790_v52, %v1665_v36  ;;  %v2757_v42 = vpop.f32.mrb[22].mxu1  ;;  %1753 = vadd.xlane.f32.xlu1 %v1736_v7 }
 0x4a5   : > { %v1718_v46 = vmax.f32 %v1674_v34, 0.0  ;;  %v1677_v9 = vadd.f32 %v2757_v42, %v3790_v52  ;;  %v1668_v12 = vpop.f32.mrb[23].mxu1  ;;  %1751 = vadd.xlane.f32.xlu0 %v1735_v37 }
 0x4a6   : > { %v1669_v13 = vadd.f32 %v3790_v52, %v1668_v12  ;;  %v1716_v48 = vmax.f32 %v1666_v40, 0.0 }
 0x4a7   : > { %v1719_v50 = vmax.f32 %v1677_v9, 0.0  ;;  %v1741_v51 = vmul.f32 %v3797_v17, %v1718_v46 }
 0x4a8   : > { %v1717_v22 = vmax.f32 %v1669_v13, 0.0  ;;  %v1739_v19 = vmul.f32 %v3797_v17, %v1716_v48 }
 0x4a9   : > { %1763 = vadd.xlane.f32.xlu1 %v1741_v51  ;;  %1757 = vadd.xlane.f32.xlu0 %v1738_v53  ;;  %v1742_v54 = vmul.f32 %v3797_v17, %v1719_v50 }
 0x4aa   : > { %v2760_v35 = vpop.f32.mrb[24].mxu1  ;;  %v1740_v4 = vmul.f32 %v3797_v17, %v1717_v22 }
 0x4ab   : > { %v1690_v14 = vadd.f32 %v2760_v35, %v3790_v52  ;;  %v1681_v18 = vpop.f32.mrb[25].mxu1 }
 0x4ac   : > { %v1682_v55 = vadd.f32 %v3790_v52, %v1681_v18  ;;  %v2761_v63 = vpop.f32.mrb[26].mxu1 }
 0x4ad   : > { %v1722_v23 = vmax.f32 %v1690_v14, 0.0  ;;  %v1693_v28 = vadd.f32 %v2761_v63, %v3790_v52  ;;  %v1684_v3 = vpop.f32.mrb[27].mxu1  ;;  %1759 = vadd.xlane.f32.xlu1 %v1739_v19  ;;  %1765 = vadd.xlane.f32.xlu0 %v1742_v54 }
 0x4ae   : > { %v1720_v7 = vmax.f32 %v1682_v55, 0.0  ;;  %v1685_v34 = vadd.f32 %v3790_v52, %v1684_v3 }
 0x4af   : > { %v1723_v32 = vmax.f32 %v1693_v28, 0.0  ;;  %v1745_v36 = vmul.f32 %v3797_v17, %v1722_v23 }
 0x4b0   : > { %v1721_v40 = vmax.f32 %v1685_v34, 0.0  ;;  %v1743_v46 = vmul.f32 %v3797_v17, %v1720_v7 }
 0x4b1   : > { %1771 = vadd.xlane.f32.xlu1 %v1745_v36  ;;  %1761 = vadd.xlane.f32.xlu0 %v1740_v4  ;;  %v1746_v9 = vmul.f32 %v3797_v17, %v1723_v32  ;;  %v1784_v36 = vstv %s1783_s30 }
 0x4b2   : > { %v2764_v37 = vpop.f32.mrb[28].mxu1  ;;  %v1744_v35 = vmul.f32 %v3797_v17, %v1721_v40 }
 0x4b3   : > { %v1697_v42 = vpop.f32.mrb[29].mxu1  ;;  %v1706_v12 = vadd.f32 %v2764_v37, %v3790_v52 }
 0x4b4   : > { %v1698_v13 = vadd.f32 %v3790_v52, %v1697_v42  ;;  %v2765_v48 = vpop.f32.mrb[30].mxu1 }
 0x4b5   : > { %v1700_v50 = vpop.f32.mrb[31].mxu1  ;;  %1767 = vadd.xlane.f32.xlu1 %v1743_v46  ;;  %1773 = vadd.xlane.f32.xlu0 %v1746_v9  ;;  %v1709_v22 = vadd.f32 %v2765_v48, %v3790_v52  ;;  %v1726_v14 = vmax.f32 %v1706_v12, 0.0 }
 0x4b6   : > { %v1724_v51 = vmax.f32 %v1698_v13, 0.0  ;;  %v1701_v53 = vadd.f32 %v3790_v52, %v1700_v50 }
 0x4b7   : > { %v1727_v55 = vmax.f32 %v1709_v22, 0.0  ;;  %v1749_v63 = vmul.f32 %v3797_v17, %v1726_v14 }
 0x4b8   : > { %v1725_v18 = vmax.f32 %v1701_v53, 0.0  ;;  %v1747_v19 = vmul.f32 %v3797_v17, %v1724_v51 }
 0x4b9   : > { %1769 = vadd.xlane.f32.xlu0 %v1744_v35  ;;  %v1750_v23 = vmul.f32 %v3797_v17, %v1727_v55 }
 0x4ba   : > { %1775 = vadd.xlane.f32.xlu1 %v1747_v19  ;;  %v1748_v54 = vmul.f32 %v3797_v17, %v1725_v18 }
 0x4bd   : > { %1777 = vadd.xlane.f32.xlu0 %v1748_v54 }
 0x4be   : > { %1779 = vadd.xlane.f32.xlu1 %v1749_v63 }
 0x4c1   : > { %1781 = vadd.xlane.f32.xlu0 %v1750_v23 }
 0x52e   : > { %v1756_v28 = vpop.xlane.xlu0 %1755 }
 0x52f   : > { %v3829_v42 = vadd.f32 %v1784_v36, %v1756_v28 }
 0x531   : > { %v1754_v52 = vpop.xlane.xlu1 %1753  ;;  %v1803_v51 = vsel %vm1316_vm8, %v3829_v42, -1e+30 }
 0x532   : > { %v1752_v3 = vpop.xlane.xlu0 %1751  ;;  %v3831_v46 = vadd.f32 %v1784_v36, %v1754_v52 }
 0x533   : > { %v3835_v12 = vadd.f32 %v1784_v36, %v1752_v3 }
 0x534   : > { %v1802_v53 = vsel %vm1315_vm9, %v3831_v46, -1e+30 }
 0x535   : > { %v1801_v18 = vsel %vm1314_vm7, %v3835_v12, -1e+30 }
 0x536   : > { %v1764_v4 = vpop.xlane.xlu1 %1763  ;;  %v1758_v7 = vpop.xlane.xlu0 %1757 }
 0x537   : > { %v3833_v9 = vadd.f32 %v1784_v36, %v1764_v4  ;;  %v3837_v17 = vadd.f32 %v1784_v36, %v1758_v7  ;;  %v1819_v4 = vsel %vm1394_vm11, %v1803_v51, -inf  ;;  %v1818_v7 = vsel %vm1394_vm11, %v1802_v53, -inf }
 0x539   : > { %v1807_v22 = vsel %vm1320_vm14, %v3833_v9, -1e+30  ;;  %v1804_v19 = vsel %vm1317_vm10, %v3837_v17, -1e+30 }
 0x53a   : > { %v1760_v32 = vpop.xlane.xlu1 %1759  ;;  %v1766_v34 = vpop.xlane.xlu0 %1765  ;;  %v1820_v51 = vsel %vm1394_vm11, %v1804_v19, -inf }
 0x53b   : > { %v3853_v35 = vadd.f32 %v1784_v36, %v1760_v32  ;;  %v3855_v14 = vadd.f32 %v1784_v36, %v1766_v34  ;;  %v1825_v32 = vsel %vm1394_vm11, %v1807_v22, -inf }
 0x53c   : > { %v1826_v38 = vmax.f32 %v1819_v4, %v1825_v32 }
 0x53d   : > { %v1805_v34 = vsel %vm1318_vm12, %v3853_v35, -1e+30 }
 0x53e   : > { %v1772_v37 = vpop.xlane.xlu1 %1771  ;;  %v1762_v40 = vpop.xlane.xlu0 %1761  ;;  %v1821_v44 = vsel %vm1394_vm11, %v1805_v34, -inf }
 0x53f   : > { %v3839_v50 = vadd.f32 %v1784_v36, %v1762_v40  ;;  %v3865_v54 = vadd.f32 %v1784_v36, %v1772_v37  ;;  %v1808_v37 = vsel %vm4338_vm15, %v3855_v14, -1e+30 }
 0x540   : > { %v1827_v39 = vsel %vm1394_vm11, %v1808_v37, -inf }
 0x541   : > { %v1806_v63 = vsel %vm1319_vm13, %v3839_v50, -1e+30  ;;  %v1811_v53 = vsel %vm1324_vm2, %v3865_v54, -1e+30 }
 0x542   : > { %v1768_v13 = vpop.xlane.xlu1 %1767  ;;  %v1774_v48 = vpop.xlane.xlu0 %1773  ;;  %v1823_v22 = vsel %vm1394_vm11, %v1806_v63, -inf  ;;  %v1833_v32 = vsel %vm1394_vm11, %v1811_v53, -inf }
 0x543   : > { %v3871_v23 = vadd.f32 %v1784_v36, %v1768_v13  ;;  %v3873_v28 = vadd.f32 %v1784_v36, %v1774_v48  ;;  %v1817_v48 = vsel %vm1394_vm11, %v1801_v18, -inf  ;;  %v1824_v8 = vmax.f32 %v1818_v7, %v1823_v22 }
 0x544   : > { %v1822_v22 = vmax.f32 %v1817_v48, %v1821_v44  ;;  %v1834_v2 = vmax.f32 %v1826_v38, %v1833_v32  ;;  %v4381_v32 = vlaneseq }
 0x545   : > { %v1809_v57 = vsel %vm1322_vm0, %v3871_v23, -1e+30 }
 0x546   : > { %v1770_v55 = vpop.xlane.xlu0 %1769  ;;  %v1829_v34 = vsel %vm1394_vm11, %v1809_v57, -inf }
 0x547   : > { %v3875_v52 = vadd.f32 %v1784_v36, %v1770_v55  ;;  %v1776_v3 = vpop.xlane.xlu1 %1775  ;;  %v1830_v47 = vmax.f32 %v1822_v22, %v1829_v34  ;;  %v3942_v34 = vshrl.u32 %v4381_v32, 7 }
 0x548   : > { %v3892_v13 = vadd.f32 %v1784_v36, %v1776_v3 }
 0x549   : > { %v1810_v40 = vsel %vm4325_vm1, %v3875_v52, -1e+30  ;;  %vm4380_vm1 = vcmp.eq.s32.totalorder %v3555_v58, %v3643_v21 }
 0x54a   : > { %v1778_v55 = vpop.xlane.xlu0 %1777  ;;  %v1812_v18 = vsel %vm4380_vm1, %v3873_v28, -1e+30  ;;  %v1831_v63 = vsel %vm1394_vm11, %v1810_v40, -inf  ;;  %v1813_v41 = vsel %vm1326_vm4, %v3892_v13, -1e+30  ;;  %vm4337_vm1 = vcmask 57344  }
 0x54b   : > { %v3909_v19 = vadd.f32 %v1784_v36, %v1778_v55  ;;  %v1780_v3 = vpop.xlane.xlu1 %1779  ;;  %v1835_v37 = vsel %vm1394_vm11, %v1812_v18, -inf  ;;  %v1832_v56 = vmax.f32 %v1824_v8, %v1831_v63  ;;  %v1837_v1 = vsel %vm1394_vm11, %v1813_v41, -inf }
 0x54c   : > { %v3914_v4 = vadd.f32 %v1784_v36, %v1780_v3  ;;  %v1828_v3 = vmax.f32 %v1820_v51, %v1827_v39  ;;  %v1838_v44 = vmax.f32 %v1830_v47, %v1837_v1 }
 0x54d   : > { %v1814_v55 = vsel %vm4340_vm5, %v3909_v19, -1e+30 }
 0x54e   : > { %v1839_v40 = vsel %vm1394_vm11, %v1814_v55, -inf  ;;  %v1815_v7 = vsel %vm1328_vm6, %v3914_v4, -1e+30  ;;  %v1782_v53 = vpop.xlane.xlu0 %1781  ;;  %v1836_v18 = vmax.f32 %v1828_v3, %v1835_v37 }
 0x54f   : > { %v3932_v61 = vadd.f32 %v1784_v36, %v1782_v53  ;;  %v1841_v57 = vsel %vm1394_vm11, %v1815_v7, -inf  ;;  %v1840_v43 = vmax.f32 %v1832_v56, %v1839_v40  ;;  %v1854_v40 = vld [vmem:[#allocation5] sm:$0x1]  ;;  %v1862_v7 = vsub.s32 0, %v3942_v34 }
 0x550   : > { %v1842_v39 = vmax.f32 %v1834_v2, %v1841_v57 }
 0x551   : > { %v1816_v55 = vsel %vm4339_vm3, %v3932_v61, -1e+30  ;;  %v1845_v36 = vmax.f32 %v1838_v44, %v1840_v43 }
 0x552   : > { %v1843_v49 = vsel %vm1394_vm11, %v1816_v55, -inf }
 0x553   : > { %v1844_v8 = vmax.f32 %v1836_v18, %v1843_v49 }
 0x555   : > { %v1846_v48 = vmax.f32 %v1842_v39, %v1844_v8 }
 0x557   : > { %v1847_v38 = vmax.f32 %v1845_v36, %v1846_v48 }
 0x559   : > { %v1848_v51 = vrot.slane %v1847_v38, 4 }
 0x55b   : > { %v1849_v41 = vmax.f32 %v1847_v38, %v1848_v51 }
 0x55d   : > { %v1850_v63 = vrot.slane %v1849_v41, 2 }
 0x55f   : > { %v1851_v56 = vmax.f32 %v1849_v41, %v1850_v63 }
 0x561   : > { %v1852_v37 = vrot.slane %v1851_v56, 1 }
 0x563   : > { %v1853_v53 = vmax.f32 %v1851_v56, %v1852_v37 }
 0x565   : > { %v1855_v22 = vmax.f32 %v1854_v40, %v1853_v53 }
 0x567   : > { %v1863_v47 = vrot.slane %v1855_v22, %v1862_v7  ;;  %v1856_v1 = vsub.f32 %v1854_v40, %v1855_v22  ;;  %2131 = vst.msk [vmem:[#allocation5] sm:$0x1] %vm4337_vm1, %v1855_v22  ;;  %vm4382_vm1 = vcmp.eq.s32.totalorder %v3555_v58, %v3626_v16 }
 0x569   : > { %v1866_v43 = vsel %vm1315_vm9, %v1863_v47, 0.0  ;;  %v1865_v49 = vsel %vm1314_vm7, %v1863_v47, 0.0  ;;  %v1868_v57 = vsel %vm1317_vm10, %v1863_v47, 0.0  ;;  %v1867_v18 = vsel %vm1316_vm8, %v1863_v47, 0.0 }
 0x56a   : > { %v1884_v2 = vsel %vm1394_vm11, %v1866_v43, 0.0  ;;  %v1881_v3 = vsel %vm1394_vm11, %v1865_v49, 0.0  ;;  %v1890_v55 = vsel %vm1394_vm11, %v1868_v57, 0.0  ;;  %v1887_v44 = vsel %vm1394_vm11, %v1867_v18, 0.0 }
 0x56b   : > { %1885 = vadd.xlane.f32.xlu0 %v1884_v2  ;;  %1882 = vadd.xlane.f32.xlu1 %v1881_v3  ;;  %v1870_v39 = vsel %vm1319_vm13, %v1863_v47, 0.0  ;;  %v1869_v8 = vsel %vm1318_vm12, %v1863_v47, 0.0  ;;  %v1857_v36 = vmul.f32 1.442695, %v1856_v1  ;;  %v1872_v51 = vsel %vm4338_vm15, %v1863_v47, 0.0 }
 0x56c   : > { %v1896_v48 = vsel %vm1394_vm11, %v1870_v39, 0.0  ;;  %v1893_v38 = vsel %vm1394_vm11, %v1869_v8, 0.0  ;;  %v1871_v41 = vsel %vm1320_vm14, %v1863_v47, 0.0  ;;  %v1902_v63 = vsel %vm1394_vm11, %v1872_v51, 0.0 }
 0x56d   : > { %2944 = vpow2.f32 %v1857_v36  ;;  %v1899_v32 = vsel %vm1394_vm11, %v1871_v41, 0.0  ;;  %v1874_v56 = vsel %vm4382_vm1, %v1863_v47, 0.0  ;;  %v1873_v37 = vsel %vm1322_vm0, %v1863_v47, 0.0 }
 0x56e   : > { %v1908_v40 = vsel %vm1394_vm11, %v1874_v56, 0.0  ;;  %v1905_v53 = vsel %vm1394_vm11, %v1873_v37, 0.0  ;;  %vm4383_vm15 = vcmp.eq.s32.totalorder %v3555_v58, %v3643_v21  ;;  %v1875_v1 = vsel %vm1324_vm2, %v1863_v47, 0.0  ;;  %v2980_v37 = vld [vmem:[%s3347_s16 + $0x10] sm:$0xff] }
 0x56f   : > { %1891 = vadd.xlane.f32.xlu0 %v1890_v55  ;;  %1888 = vadd.xlane.f32.xlu1 %v1887_v44  ;;  %v1876_v22 = vsel %vm4383_vm15, %v1863_v47, 0.0  ;;  %v1911_v2 = vsel %vm1394_vm11, %v1875_v1, 0.0  ;;  %v1878_v57 = vsel %vm4340_vm5, %v1863_v47, 0.0  ;;  %v1877_v18 = vsel %vm1326_vm4, %v1863_v47, 0.0 }
 0x570   : > { %v1914_v49 = vsel %vm1394_vm11, %v1876_v22, 0.0  ;;  %v1920_v55 = vsel %vm1394_vm11, %v1878_v57, 0.0  ;;  %v1917_v44 = vsel %vm1394_vm11, %v1877_v18, 0.0  ;;  %v1879_v39 = vsel %vm1328_vm6, %v1863_v47, 0.0  ;;  %v2982_v18 = vld [vmem:[%s3347_s16 + $0x28] sm:$0xff] }
 0x571   : > { %v1923_v36 = vsel %vm1394_vm11, %v1879_v39, 0.0 }
 0x573   : > { %1897 = vadd.xlane.f32.xlu0 %v1896_v48  ;;  %1894 = vadd.xlane.f32.xlu1 %v1893_v38  ;;  %v2978_v48 = vld [vmem:[%s3347_s16] sm:$0xff]  ;;  %v2979_v38 = vld [vmem:[%s3347_s16 + $0x8] sm:$0xff] }
 0x574   : > { %vm1337_vm15 = vcmp.ge.s32.totalorder %v2978_v48, 0  ;;  %vm1338_vm1 = vcmp.ge.s32.totalorder %v2979_v38, 0  ;;  %v2984_v38 = vld [vmem:[%s3347_s16 + $0x38] sm:$0xff] }
 0x577   : > { %1903 = vadd.xlane.f32.xlu0 %v1902_v63  ;;  %1900 = vadd.xlane.f32.xlu1 %v1899_v32  ;;  %v3992_v43 = vpop.eup %2944 }
 0x578   : > { %v3997_v3 = vrot.slane %v3992_v43, %v1862_v7  ;;  %v1880_v7 = vsel %vm4339_vm3, %v1863_v47, 0.0  ;;  %vm1339_vm3 = vcmp.ge.s32.totalorder %v2980_v37, 0 }
 0x579   : > { %v1926_v8 = vsel %vm1394_vm11, %v1880_v7, 0.0 }
 0x57b   : > { %1909 = vadd.xlane.f32.xlu0 %v1908_v40  ;;  %1906 = vadd.xlane.f32.xlu1 %v1905_v53  ;;  %v2981_v40 = vld [vmem:[%s3347_s16 + $0x18] sm:$0xff] }
 0x57c   : > { %vm1340_vm5 = vcmp.ge.s32.totalorder %v2981_v40, 0 }
 0x57f   : > { %1915 = vadd.xlane.f32.xlu0 %v1914_v49  ;;  %1912 = vadd.xlane.f32.xlu1 %v1911_v2 }
 0x583   : > { %1921 = vadd.xlane.f32.xlu0 %v1920_v55  ;;  %1918 = vadd.xlane.f32.xlu1 %v1917_v44  ;;  %v2983_v55 = vld [vmem:[%s3347_s16 + $0x20] sm:$0xff] }
 0x587   : > { %1927 = vadd.xlane.f32.xlu0 %v1926_v8  ;;  %1924 = vadd.xlane.f32.xlu1 %v1923_v36 }
 0x5f8   : > { %v1886_v51 = vpop.xlane.xlu0 %1885  ;;  %v1883_v41 = vpop.xlane.xlu1 %1882 }
 0x5f9   : > { %v1930_v63 = vsub.f32 %v3831_v46, %v1886_v51  ;;  %v1929_v32 = vsub.f32 %v3835_v12, %v1883_v41  ;;  %v2985_v51 = vld [vmem:[%s3347_s16 + $0x30] sm:$0xff] }
 0x5fb   : > { %v1946_v56 = vsel %vm1338_vm1, %v1930_v63, -1e+30  ;;  %v1945_v47 = vsel %vm1337_vm15, %v1929_v32, -1e+30  ;;  %vm1342_vm15 = vcmp.ge.s32.totalorder %v2982_v18, 0  ;;  %vm1341_vm1 = vcmp.ge.s32.totalorder %v2983_v55, 0 }
 0x5fc   : > { %v1963_v53 = vmul.f32 1.442695, %v1946_v56  ;;  %v1961_v22 = vmul.f32 1.442695, %v1945_v47  ;;  %v1892_v1 = vpop.xlane.xlu0 %1891  ;;  %v1889_v49 = vpop.xlane.xlu1 %1888  ;;  %v2988_v55 = vld [vmem:[%s3347_s16 + $0x58] sm:$0xff] }
 0x5fd   : > { %v1932_v2 = vsub.f32 %v3837_v17, %v1892_v1  ;;  %v1931_v57 = vsub.f32 %v3829_v42, %v1889_v49 }
 0x5fe   : > { %2946 = vpow2.f32 %v1963_v53  ;;  %v2986_v53 = vld [vmem:[%s3347_s16 + $0x48] sm:$0xff] }
 0x5ff   : > { %2948 = vpow2.f32 %v1961_v22  ;;  %v1948_v46 = vsel %vm1340_vm5, %v1932_v2, -1e+30  ;;  %v1947_v12 = vsel %vm1339_vm3, %v1931_v57, -1e+30  ;;  %vm1344_vm5 = vcmp.ge.s32.totalorder %v2984_v38, 0  ;;  %v2987_v22 = vld [vmem:[%s3347_s16 + $0x40] sm:$0xff] }
 0x600   : > { %v1965_v44 = vmul.f32 1.442695, %v1947_v12  ;;  %v1898_v7 = vpop.xlane.xlu0 %1897  ;;  %v1895_v39 = vpop.xlane.xlu1 %1894  ;;  %v1967_v17 = vmul.f32 1.442695, %v1948_v46  ;;  %vm1343_vm3 = vcmp.ge.s32.totalorder %v2985_v51, 0  ;;  %v2990_v51 = vld [vmem:[%s3347_s16 + $0x68] sm:$0xff] }
 0x601   : > { %v1934_v8 = vsub.f32 %v3839_v50, %v1898_v7  ;;  %v1933_v36 = vsub.f32 %v3853_v35, %v1895_v39 }
 0x602   : > { %2950 = vpow2.f32 %v1965_v44  ;;  %v2989_v44 = vld [vmem:[%s3347_s16 + $0x50] sm:$0xff] }
 0x603   : > { %v1950_v42 = vsel %vm1342_vm15, %v1934_v8, -1e+30  ;;  %v1949_v48 = vsel %vm1341_vm1, %v1933_v36, -1e+30  ;;  %2952 = vpow2.f32 %v1967_v17  ;;  %vm1346_vm15 = vcmp.ge.s32.totalorder %v2986_v53, 0  ;;  %v2992_v53 = vld [vmem:[%s3347_s16 + $0x70] sm:$0xff] }
 0x604   : > { %v1969_v41 = vmul.f32 1.442695, %v1949_v48  ;;  %v1904_v63 = vpop.xlane.xlu0 %1903  ;;  %v1901_v32 = vpop.xlane.xlu1 %1900  ;;  %v1971_v50 = vmul.f32 1.442695, %v1950_v42  ;;  %vm1345_vm1 = vcmp.ge.s32.totalorder %v2987_v22, 0 }
 0x605   : > { %v1936_v56 = vsub.f32 %v3855_v14, %v1904_v63  ;;  %v1935_v47 = vsub.f32 %v3833_v9, %v1901_v32 }
 0x606   : > { %2954 = vpow2.f32 %v1969_v41  ;;  %v2991_v41 = vld [vmem:[%s3347_s16 + $0x60] sm:$0xff] }
 0x607   : > { %v1952_v35 = vsel %vm1344_vm5, %v1936_v56, -1e+30  ;;  %v1951_v37 = vsel %vm1343_vm3, %v1935_v47, -1e+30  ;;  %2956 = vpow2.f32 %v1971_v50  ;;  %vm1348_vm5 = vcmp.ge.s32.totalorder %v2988_v55, 0 }
 0x608   : > { %v2947_v40 = vpop.eup %2946  ;;  %v1973_v1 = vmul.f32 1.442695, %v1951_v37  ;;  %v1910_v49 = vpop.xlane.xlu0 %1909  ;;  %v1975_v46 = vmul.f32 1.442695, %v1952_v35  ;;  %vm1347_vm3 = vcmp.ge.s32.totalorder %v2989_v44, 0 }
 0x609   : > { %v1907_v2 = vpop.xlane.xlu1 %1906  ;;  %v2949_v57 = vpop.eup %2948  ;;  %v1938_v14 = vsub.f32 %v3875_v52, %v1910_v49  ;;  %2002 = vperm.xlu0 %2925, %v2947_v40  }
 0x60a   : > { %v1937_v9 = vsub.f32 %v3871_v23, %v1907_v2  ;;  %1997 = vperm.xlu1 %2926, %v2949_v57   ;;  %2958 = vpow2.f32 %v1973_v1  ;;  %v2993_v57 = vld [vmem:[%s3347_s16 + $0x78] sm:$0xff] }
 0x60b   : > { %v1954_v12 = vsel %vm1346_vm15, %v1938_v14, -1e+30  ;;  %2960 = vpow2.f32 %v1975_v46  ;;  %vm1350_vm15 = vcmp.ge.s32.totalorder %v2990_v51, 0 }
 0x60c   : > { %v1953_v18 = vsel %vm1345_vm1, %v1937_v9, -1e+30  ;;  %v1916_v39 = vpop.xlane.xlu0 %1915  ;;  %v2951_v36 = vpop.eup %2950  ;;  %v1979_v17 = vmul.f32 1.442695, %v1954_v12  ;;  %vm1349_vm1 = vcmp.ge.s32.totalorder %v2991_v41, 0 }
 0x60d   : > { %v1977_v7 = vmul.f32 1.442695, %v1953_v18  ;;  %v1913_v8 = vpop.xlane.xlu1 %1912  ;;  %v1940_v52 = vsub.f32 %v3873_v28, %v1916_v39  ;;  %v2953_v38 = vpop.eup %2952 }
 0x60e   : > { %v1939_v23 = vsub.f32 %v3865_v54, %v1913_v8  ;;  %2007 = vperm.xlu1 %2926, %v2951_v36  }
 0x60f   : > { %2962 = vpow2.f32 %v1977_v7  ;;  %v1956_v42 = vsel %vm1348_vm5, %v1940_v52, -1e+30  ;;  %vm1351_vm5 = vcmp.ge.s32.totalorder %v2992_v53, 0 }
 0x610   : > { %v1955_v48 = vsel %vm1347_vm3, %v1939_v23, -1e+30  ;;  %v1922_v32 = vpop.xlane.xlu0 %1921  ;;  %v2955_v47 = vpop.eup %2954  ;;  %2964 = vpow2.f32 %v1979_v17  ;;  %v1983_v50 = vmul.f32 1.442695, %v1956_v42  ;;  %vm1352_vm3 = vcmp.ge.s32.totalorder %v2993_v57, 0  ;;  %v2132_v17 = vld [vmem:[#allocation3] sm:$0xff] }
 0x611   : > { %v1981_v63 = vmul.f32 1.442695, %v1955_v48  ;;  %v1919_v56 = vpop.xlane.xlu1 %1918  ;;  %v1942_v28 = vsub.f32 %v3909_v19, %v1922_v32  ;;  %2017 = vperm.xlu0 %2925, %v2955_v47   ;;  %v2957_v40 = vpop.eup %2956  ;;  %v4384_v23 = vmov 0.0   ;;  %v2139_v42 = vmul.f32 %v3997_v3, %v2132_v17 }
 0x612   : > { %v1941_v54 = vsub.f32 %v3892_v13, %v1919_v56  ;;  %2012 = vperm.xlu1 %2926, %v2953_v38  }
 0x613   : > { %2966 = vpow2.f32 %v1981_v63  ;;  %v1958_v35 = vsel %vm1350_vm15, %v1942_v28, -1e+30  ;;  %vm3156_vm15 = vmmov 0   ;;  %v2140_v48 = vsel %vm1394_vm11, %v2139_v42, 0.0 }
 0x614   : > { %v1957_v37 = vsel %vm1349_vm1, %v1941_v54, -1e+30  ;;  %v1928_v1 = vpop.xlane.xlu0 %1927  ;;  %v2959_v2 = vpop.eup %2958  ;;  %2968 = vpow2.f32 %v1983_v50  ;;  %v1987_v14 = vmul.f32 1.442695, %v1958_v35  ;;  %2782 = vmatprep.mubr.msk.bf16.mxu0 %vm3156_vm15, %v4384_v23 }
 0x615   : > { %v1985_v22 = vmul.f32 1.442695, %v1957_v37  ;;  %v1925_v49 = vpop.xlane.xlu1 %1924  ;;  %v1944_v19 = vsub.f32 %v3932_v61, %v1928_v1  ;;  %2027 = vperm.xlu0 %2925, %v2959_v2   ;;  %v2961_v46 = vpop.eup %2960 }
 0x616   : > { %v1943_v13 = vsub.f32 %v3914_v4, %v1925_v49  ;;  %2022 = vperm.xlu1 %2926, %v2957_v40  }
 0x617   : > { %2970 = vpow2.f32 %v1985_v22  ;;  %v1960_v12 = vsel %vm1352_vm3, %v1944_v19, -1e+30 }
 0x618   : > { %v1959_v9 = vsel %vm1351_vm5, %v1943_v13, -1e+30  ;;  %2972 = vpow2.f32 %v1987_v14  ;;  %v1991_v44 = vmul.f32 1.442695, %v1960_v12  ;;  %v4385_v14 = vld [vmem:[#allocation29_spill] sm:$0xff] }
 0x619   : > { %v1989_v18 = vmul.f32 1.442695, %v1959_v9  ;;  %v2963_v55 = vpop.eup %2962 }
 0x61a   : > { %2032 = vperm.xlu1 %2926, %v2961_v46   ;;  %2037 = vperm.xlu0 %2925, %v2963_v55   ;;  %v2965_v7 = vpop.eup %2964 }
 0x61b   : > { %2974 = vpow2.f32 %v1989_v18 }
 0x61c   : > { %2976 = vpow2.f32 %v1991_v44 }
 0x61d   : > { %v2967_v39 = vpop.eup %2966 }
 0x61e   : > { %2042 = vperm.xlu1 %2926, %v2965_v7   ;;  %2047 = vperm.xlu0 %2925, %v2967_v39   ;;  %v2969_v61 = vpop.eup %2968  ;;  %v4387_v7 = vld [vmem:[#allocation27_spill] sm:$0xff] }
 0x621   : > { %v2971_v4 = vpop.eup %2970 }
 0x622   : > { %2052 = vperm.xlu1 %2926, %v2969_v61   ;;  %2057 = vperm.xlu0 %2925, %v2971_v4   ;;  %v2973_v8 = vpop.eup %2972  ;;  %v4388_v4 = vld [vmem:[#allocation28_spill] sm:$0xff] }
 0x625   : > { %v2975_v36 = vpop.eup %2974 }
 0x626   : > { %2062 = vperm.xlu1 %2926, %v2973_v8   ;;  %2067 = vperm.xlu0 %2925, %v2975_v36   ;;  %v2977_v52 = vpop.eup %2976 }
 0x62a   : > { %2072 = vperm.xlu1 %2926, %v2977_v52  }
 0x645   : > { %2141 = vadd.xlane.f32.xlu0 %v2140_v48 }
 0x688   : > { %v2003_v38 = vpop.permute.xlu0 %2002 }
 0x689   : > { %v2149_v51 = vmul.f32 %v2003_v38, %v3745_v33  ;;  %v1998_v41 = vpop.permute.xlu1 %1997  ;;  %v2076_v63 = vsel %vm1315_vm9, %v2003_v38, 0.0  ;;  %vm4392_vm9 = vcmp.eq.s32.totalorder %v3555_v58, %v3643_v21 }
 0x68a   : > { %v2075_v32 = vsel %vm1314_vm7, %v1998_v41, 0.0  ;;  %v2148_v56 = vmul.f32 %v1998_v41, %v3741_v27  ;;  %v2092_v3 = vsel %vm1394_vm11, %v2076_v63, 0.0  ;;  %vm4386_vm7 = vcmp.eq.s32.totalorder %v3555_v58, %v3609_v11 }
 0x68b   : > { %v2091_v28 = vsel %vm1394_vm11, %v2075_v32, 0.0  ;;  %v4391_v32 = vld [vmem:[#allocation33_spill] sm:$0xff] }
 0x68c   : > { %v2164_v47 = vpack.c.bf16 %v2149_v51, %v2148_v56  ;;  %v2093_v50 = vadd.f32 %v2092_v3, %v2091_v28  ;;  %v4390_v51 = vld [vmem:[#allocation31_spill] sm:$0xff] }
 0x68d   : > { %v2008_v54 = vpop.permute.xlu1 %2007 }
 0x68e   : > { %v2077_v33 = vsel %vm1316_vm8, %v2008_v54, 0.0  ;;  %2767 = vmatpush3.bf16.msra.mxu0 %v2164_v47  ;;  %v2150_v59 = vmul.f32 %v2008_v54, %v3739_v24  ;;  %vm4389_vm8 = vcmp.eq.s32.totalorder %v3555_v58, %v3626_v16 }
 0x68f   : > { %v2094_v62 = vsel %vm1394_vm11, %v2077_v33, 0.0  ;;  %2768 = vmatprep.subr.bf16.mxu0 %v4384_v23 }
 0x690   : > { %v2018_v35 = vpop.permute.xlu0 %2017  ;;  %v2095_v37 = vadd.f32 %v2094_v62, %v2093_v50  ;;  %v4393_v50 = vld [vmem:[#allocation30_spill] sm:$0xff] }
 0x691   : > { %v2013_v27 = vpop.permute.xlu1 %2012  ;;  %v2079_v40 = vsel %vm1318_vm12, %v2018_v35, 0.0  ;;  %vm4400_vm12 = vcmp.eq.s32.totalorder %v3555_v58, %v3677_v31  ;;  %v1993_v31 = vld [vmem:[#allocation6] sm:$0x1] }
 0x692   : > { %v2078_v60 = vsel %vm1317_vm10, %v2013_v27, 0.0  ;;  %v2151_v53 = vmul.f32 %v2013_v27, %v3743_v29  ;;  %v2098_v2 = vsel %vm1394_vm11, %v2079_v40, 0.0  ;;  %v2152_v29 = vmul.f32 %v2018_v35, %v3753_v45  ;;  %v4394_v27 = vld [vmem:[#allocation32_spill] sm:$0xff] }
 0x693   : > { %v2096_v22 = vsel %vm1394_vm11, %v2078_v60, 0.0  ;;  %vm4395_vm10 = vcmp.eq.s32.totalorder %v3555_v58, %v3660_v26  ;;  %v2458_v26 = vld [vmem:[%s670_s21] ss:$0 sm:$0xff] }
 0x694   : > { %v2097_v1 = vadd.f32 %v2096_v22, %v2095_v37  ;;  %v2165_v49 = vpack.c.bf16 %v2151_v53, %v2150_v59  ;;  %v2028_v24 = vpop.permute.xlu0 %2027 }
 0x695   : > { %v2023_v57 = vpop.permute.xlu1 %2022  ;;  %v2081_v19 = vsel %vm1320_vm14, %v2028_v24, 0.0  ;;  %v2154_v39 = vmul.f32 %v2028_v24, %v4387_v7 }
 0x696   : > { %v2099_v5 = vadd.f32 %v2098_v2, %v2097_v1  ;;  %v2080_v0 = vsel %vm1319_vm13, %v2023_v57, 0.0  ;;  %2769 = vmatpush3.bf16.msra.mxu0 %v2165_v49  ;;  %v2153_v9 = vmul.f32 %v2023_v57, %v4385_v14  ;;  %v2102_v12 = vsel %vm1394_vm11, %v2081_v19, 0.0  ;;  %v4396_v2 = vld [vmem:[#allocation35_spill] sm:$0xff]  ;;  %v4397_v19 = vld [vmem:[#allocation37_spill] sm:$0xff]  ;;  %v4399_v14 = vld [vmem:[#allocation34_spill] sm:$0xff] }
 0x697   : > { %v2100_v13 = vsel %vm1394_vm11, %v2080_v0, 0.0  ;;  %2770 = vmatprep.subr.bf16.mxu0 %v4384_v23  ;;  %vm1336_vm13 = vcmp.eq.s32.totalorder %v3942_v34, %v2458_v26 }
 0x698   : > { %v2101_v46 = vadd.f32 %v2100_v13, %v2099_v5  ;;  %v2166_v18 = vpack.c.bf16 %v2153_v9, %v2152_v29  ;;  %vm2494_vm14 = vmpackc.low %vm1336_vm13, %vm1336_vm13 }
 0x699   : > { %v2038_v10 = vpop.permute.xlu0 %2037  ;;  %v2033_v55 = vpop.permute.xlu1 %2032 }
 0x69a   : > { %v2083_v6 = vsel %vm1322_vm0, %v2038_v10, 0.0  ;;  %v2103_v44 = vadd.f32 %v2102_v12, %v2101_v46  ;;  %v2082_v45 = vsel %vm4386_vm7, %v2033_v55, 0.0  ;;  %v2155_v8 = vmul.f32 %v2033_v55, %v4388_v4  ;;  %2771 = vmatpush3.bf16.msra.mxu0 %v2166_v18  ;;  %v4401_v18 = vld [vmem:[#allocation36_spill] sm:$0xff] }
 0x69b   : > { %v2104_v61 = vsel %vm1394_vm11, %v2082_v45, 0.0  ;;  %2772 = vmatprep.subr.bf16.mxu0 %v4384_v23  ;;  %v2106_v52 = vsel %vm1394_vm11, %v2083_v6, 0.0  ;;  %v2156_v41 = vmul.f32 %v2038_v10, %v4390_v51  ;;  %vm4403_vm0 = vcmask (!%p2496_p1), 57344  }
 0x69c   : > { %v2105_v36 = vadd.f32 %v2104_v61, %v2103_v44  ;;  %v2167_v17 = vpack.c.bf16 %v2155_v8, %v2154_v39  ;;  %v3157_v61 = vmov 1.0|1.0   ;;  %v1994_v8 = vmul.f32 %v3992_v43, %v1993_v31  ;;  %v2220_v43 = vld [vmem:[#allocation5] sm:$0x1] (!%p2496_p1) }
 0x69d   : > { %v2048_v15 = vpop.permute.xlu0 %2047  ;;  %v2043_v42 = vpop.permute.xlu1 %2042  ;;  %2221 = vst.msk [vmem:[%s649_s14] sm:$0x1] (!%p2496_p1), %vm4403_vm0, %v2220_v43 }
 0x69e   : > { %v2085_v11 = vsel %vm1324_vm2, %v2048_v15, 0.0  ;;  %v2107_v48 = vadd.f32 %v2106_v52, %v2105_v36  ;;  %v2084_v38 = vsel %vm4389_vm8, %v2043_v42, 0.0  ;;  %v2157_v56 = vmul.f32 %v2043_v42, %v4391_v32  ;;  %2773 = vmatpush3.bf16.msra.mxu0 %v2167_v17  ;;  %v2143_v17 = vld [vmem:[#allocation4] sm:$0xff]  ;;  %vm4404_vm2 = vmmov (!%p2496_p1), %vm4403_vm0 }
 0x69f   : > { %v2108_v63 = vsel %vm1394_vm11, %v2084_v38, 0.0  ;;  %2774 = vmatprep.subr.bf16.mxu0 %v4384_v23  ;;  %v2110_v3 = vsel %vm1394_vm11, %v2085_v11, 0.0  ;;  %v2158_v59 = vmul.f32 %v2048_v15, %v4393_v50 }
 0x6a0   : > { %v2109_v47 = vadd.f32 %v2108_v63, %v2107_v48  ;;  %v2168_v28 = vpack.c.bf16 %v2157_v56, %v2156_v41 }
 0x6a1   : > { %v2058_v20 = vpop.permute.xlu0 %2057  ;;  %v2053_v54 = vpop.permute.xlu1 %2052 }
 0x6a2   : > { %v2087_v16 = vsel %vm1326_vm4, %v2058_v20, 0.0  ;;  %v2111_v33 = vadd.f32 %v2110_v3, %v2109_v47  ;;  %v2086_v62 = vsel %vm4392_vm9, %v2053_v54, 0.0  ;;  %v2159_v37 = vmul.f32 %v2053_v54, %v4394_v27  ;;  %2775 = vmatpush3.bf16.msra.mxu0 %v2168_v28 }
 0x6a3   : > { %v2112_v35 = vsel %vm1394_vm11, %v2086_v62, 0.0  ;;  %2776 = vmatprep.subr.bf16.mxu0 %v4384_v23  ;;  %v2114_v60 = vsel %vm1394_vm11, %v2087_v16, 0.0  ;;  %v2160_v24 = vmul.f32 %v2058_v20, %v4396_v2 }
 0x6a4   : > { %v2113_v40 = vadd.f32 %v2112_v35, %v2111_v33  ;;  %v2169_v25 = vpack.c.bf16 %v2159_v37, %v2158_v59 }
 0x6a5   : > { %v2068_v53 = vpop.permute.xlu0 %2067  ;;  %v2063_v22 = vpop.permute.xlu1 %2062 }
 0x6a6   : > { %v2089_v21 = vsel %vm1328_vm6, %v2068_v53, 0.0  ;;  %v2115_v1 = vadd.f32 %v2114_v60, %v2113_v40  ;;  %v2088_v49 = vsel %vm4395_vm10, %v2063_v22, 0.0  ;;  %v2161_v5 = vmul.f32 %v2063_v22, %v4397_v19  ;;  %2777 = vmatpush3.bf16.msra.mxu0 %v2169_v25 }
 0x6a7   : > { %v2116_v57 = vsel %vm1394_vm11, %v2088_v49, 0.0  ;;  %2778 = vmatprep.subr.bf16.mxu0 %v4384_v23  ;;  %v2118_v29 = vsel %vm1394_vm11, %v2089_v21, 0.0  ;;  %v2162_v9 = vmul.f32 %v2068_v53, %v4399_v14 }
 0x6a8   : > { %v2117_v0 = vadd.f32 %v2116_v57, %v2115_v1  ;;  %v2170_v13 = vpack.c.bf16 %v2161_v5, %v2160_v24 }
 0x6a9   : > { %v2073_v30 = vpop.permute.xlu1 %2072 }
 0x6aa   : > { %v2119_v46 = vadd.f32 %v2118_v29, %v2117_v0  ;;  %v2090_v12 = vsel %vm4400_vm12, %v2073_v30, 0.0  ;;  %v2163_v10 = vmul.f32 %v2073_v30, %v4401_v18  ;;  %2779 = vmatpush3.bf16.msra.mxu0 %v2170_v13 }
 0x6ab   : > { %v2120_v55 = vsel %vm1394_vm11, %v2090_v12, 0.0  ;;  %2780 = vmatprep.subr.bf16.mxu0 %v4384_v23  ;;  %vm4402_vm11 = vcmask 57344  }
 0x6ac   : > { %v2121_v6 = vadd.f32 %v2120_v55, %v2119_v46  ;;  %v2171_v44 = vpack.c.bf16 %v2163_v10, %v2162_v9 }
 0x6ae   : > { %v2122_v45 = vrot.slane %v2121_v6, 4  ;;  %2781 = vmatpush3.bf16.msra.mxu0 %v2171_v44 }
 0x6b0   : > { %v2123_v7 = vadd.f32 %v2122_v45, %v2121_v6 }
 0x6b1   : > { %2783 = vmatmul.mubr.msk.bf16.vlgmr.msra.gmra.mrb[32].mxu0 %vm2494_vm14, %v3157_v61 }
 0x6b2   : > { %v2124_v39 = vrot.slane %v2123_v7, 2 }
 0x6b4   : > { %v2125_v58 = vadd.f32 %v2124_v39, %v2123_v7 }
 0x6b6   : > { %v2126_v4 = vrot.slane %v2125_v58, 1 }
 0x6b8   : > { %v2127_v36 = vadd.f32 %v2126_v4, %v2125_v58 }
 0x6ba   : > { %v2128_v52 = vadd.f32 %v2127_v36, %v1994_v8 }
 0x6bc   : > { %2130 = vst.msk [vmem:[#allocation6] sm:$0x1] %vm4402_vm11, %v2128_v52 }
 0x6c3   : > { %v2222_v41 = vld [vmem:[#allocation6] sm:$0x1] (!%p2496_p1) }
 0x6c4   : > { %2223 = vst.msk [vmem:[%s4341_s13] sm:$0x1] (!%p2496_p1), %vm4404_vm2, %v2222_v41 }
 0x6d2   : > { %v2142_v23 = vpop.xlane.xlu0 %2141 }
 0x6d3   : > { %v2144_v15 = vmul.f32 %v2143_v17, %v2142_v23 }
 0x781   : > { %2217 = sbr.rel (%p2496_p1) target bundleno = 1936 (0x790), region = 92 }
 0x784   : > { %v2206_v34 = vpop.f32.mrb[32].mxu0 }
 0x785   : > { %v2212_v42 = vadd.f32 %v2206_v34, %v2144_v15  ;;  %v2784_v11 = vpop.f32.mrb[33].mxu0 }
 0x786   : > { %v2209_v48 = vpop.f32.mrb[34].mxu0 }
 0x787   : > { %2213 = vst [vmem:[#allocation4] sm:$0xff] %v2212_v42  ;;  %v2785_v38 = vpop.f32.mrb[35].mxu0 }
 0x78e   : > { %v2218_v51 = vld [vmem:[#allocation4] sm:$0xff] }
 0x78f   : > { %2219 = vst [vmem:[%s3354_s22] sm:$0xff] %v2218_v51 }
 0x790 PF: > { %s4405_s29 = sld [smem:[#allocation21_spill]]  ;;  %s4407_s1 = sld [smem:[#allocation18_spill]] }
 0x791   : > { %s4409_s28 = sld [smem:[#allocation44_spill]]  ;;  %s2259_s27 = sshll.u32 %s649_s14, 4  ;;  %s4167_s27 = int_to_ptr.vmem [resolvable:$true] %s2259_s27 }
 0x792   : > { %s2994_s30 = scalar_lea.vmem %s4167_s27, 16  ;;  %s3158_s16 = smov [#allocation10]  }
 0x793   : > { %p2995_p2 = scmp.ne.s32.totalorder %s4167_s27, %s2994_s30  ;;  %s2998_s0 = sshll.u32 %s3158_s16, 4  ;;  %s2999_s0 = int_to_ptr.vmem [resolvable:$false] %s2998_s0 }
 0x794   : > { %s3000_s26 = scalar_lea.vmem %s2999_s0, 32  ;;  %p3001_p6 = scmp.lt.s32.totalorder %s4167_s27, %s2999_s0 }
 0x795   : > { %p2996_p4 = pnand %p2995_p2, %p3310_p3  ;;  %p3002_p7 = scmp.lt.s32.totalorder %s3000_s26, %s2994_s30 }
 0x796   : > { %s4406_s21 = sadd.s32 4294967295, %s4405_s29   ;;  %s2499_s20 = sshll.u32 %s4407_s1, 4 }
 0x797   : > { %s4155_s17 = sand.u32 1, %s4406_s21   ;;  %s4163_s23 = scalar_lea.hbm %s4409_s28, %s2499_s20 }
 0x798   : > { %s2498_s24 = sshll.u32 %s4407_s1, 7  ;;  %s2230_s18 = scalar_lea.sflag [#allocation11], %s4155_s17 }
 0x799   : > { %p2997_p5 = pneg %p2996_p4  ;;  %p3003_p8 = por %p3002_p7, %p3001_p6 }
 0x79b   : > { %p3004_p10 = pnand %p3003_p8, %p2997_p5 }
 0x79d   : > { %3007 = shalt.err (!%p3004_p10)
}
 0x79e   : > { %s3008_s14 = scalar_lea.hbm %s4163_s23, 16  ;;  %s3012_s15 = scalar_lea.hbm %s4409_s28, 32 }
 0x79f   : > { %p3009_p11 = scmp.ne.s32.totalorder %s4163_s23, %s3008_s14  ;;  %p3013_p0 = scmp.lt.u32.totalorder %s4163_s23, %s4409_s28 }
 0x7a0   : > { %p3014_p1 = scmp.lt.u32.totalorder %s3012_s15, %s3008_s14  ;;  %p3016_p4 = scmp.lt.u32.totalorder %s3008_s14, %s4163_s23 }
 0x7a1   : > { %p3010_p12 = pnand %p3009_p11, %p3310_p3 }
 0x7a2   : > { %p3015_p2 = por %p3014_p1, %p3013_p0 }
 0x7a3   : > { %p3011_p13 = pneg %p3010_p12 }
 0x7a4   : > { %p3017_p5 = por %p3016_p4, %p3015_p2 }
 0x7a6   : > { %p3018_p6 = pnand %p3017_p5, %p3011_p13 }
 0x7a8   : > { %3021 = shalt.err (!%p3018_p6)
}
 0x7a9   : > { %2837 = dma.vmem_to_hbm [thread:$0]  (%p3310_p3), %s4167_s27, 16, %s4163_s23, %s2230_s18  }
 0x7aa   : > { %s4410_s26 = sld [smem:[#allocation43_spill]]  ;;  %s2246_s29 = sshll.u32 %s3354_s22, 4  ;;  %s4202_s29 = int_to_ptr.vmem [resolvable:$true] %s2246_s29 }
 0x7ab   : > { %s4411_s25 = sld [smem:[#allocation45_spill]]  ;;  %s2225_s13 = scalar_lea.sflag [#allocation9], %s3333_s2 }
 0x7ac   : > { %s3022_s23 = scalar_lea.vmem %s4202_s29, 128  ;;  %s3159_s27 = smov [#allocation8]  }
 0x7ad   : > { %p3023_p7 = scmp.ne.s32.totalorder %s4202_s29, %s3022_s23 }
 0x7af   : > { %p3024_p8 = pnand %p3023_p7, %p3310_p3 }
 0x7b0   : > { %s4199_s14 = scalar_lea.hbm %s4410_s26, %s2498_s24  ;;  %s3026_s24 = sshll.u32 %s3159_s27, 4  ;;  %s3027_s24 = int_to_ptr.vmem [resolvable:$false] %s3026_s24 }
 0x7b1   : > { %s4209_s16 = scalar_lea.hbm %s4411_s25, %s2499_s20  ;;  %p3025_p10 = pneg %p3024_p8 }
 0x7b2   : > { %s3028_s22 = scalar_lea.vmem %s3027_s24, 256  ;;  %p3029_p11 = scmp.lt.s32.totalorder %s4202_s29, %s3027_s24 }
 0x7b3   : > { %p3030_p12 = scmp.lt.s32.totalorder %s3028_s22, %s3022_s23 }
 0x7b5   : > { %p3031_p13 = por %p3030_p12, %p3029_p11 }
 0x7b7   : > { %p3032_p0 = pnand %p3031_p13, %p3025_p10 }
 0x7b9   : > { %3035 = shalt.err (!%p3032_p0)
}
 0x7ba   : > { %s3036_s1 = scalar_lea.hbm %s4199_s14, 128  ;;  %s3040_s0 = scalar_lea.hbm %s4410_s26, 256 }
 0x7bb   : > { %p3037_p1 = scmp.ne.s32.totalorder %s4199_s14, %s3036_s1  ;;  %p3041_p5 = scmp.lt.u32.totalorder %s4199_s14, %s4410_s26 }
 0x7bc   : > { %p3042_p6 = scmp.lt.u32.totalorder %s3040_s0, %s3036_s1  ;;  %p3044_p8 = scmp.lt.u32.totalorder %s3036_s1, %s4199_s14 }
 0x7bd   : > { %p3038_p2 = pnand %p3037_p1, %p3310_p3 }
 0x7be   : > { %p3043_p7 = por %p3042_p6, %p3041_p5 }
 0x7bf   : > { %p3039_p4 = pneg %p3038_p2 }
 0x7c0   : > { %p3045_p10 = por %p3044_p8, %p3043_p7 }
 0x7c2   : > { %p3046_p11 = pnand %p3045_p10, %p3039_p4 }
 0x7c4   : > { %3049 = shalt.err (!%p3046_p11)
}
 0x7c5   : > { %2836 = dma.vmem_to_hbm [thread:$0]  (%p3310_p3), %s4202_s29, 128, %s4199_s14, %s2225_s13  }
 0x7c6   : > { %s4412_s23 = scalar_lea.vmem [#allocation12], %s3333_s2  ;;  %s3160_s22 = smov [#allocation12]  }
 0x7c7   : > { %s2272_s27 = sshll.u32 %s4412_s23, 4  ;;  %s3054_s1 = sshll.u32 %s3160_s22, 4  ;;  %s2273_s27 = int_to_ptr.vmem [resolvable:$true] %s2272_s27  ;;  %s3055_s1 = int_to_ptr.vmem [resolvable:$false] %s3054_s1 }
 0x7c8   : > { %s3050_s24 = scalar_lea.vmem %s2273_s27, 16  ;;  %s3056_s20 = scalar_lea.vmem %s3055_s1, 32 }
 0x7c9   : > { %p3051_p12 = scmp.ne.s32.totalorder %s2273_s27, %s3050_s24  ;;  %p3057_p1 = scmp.lt.s32.totalorder %s2273_s27, %s3055_s1 }
 0x7ca   : > { %p3058_p2 = scmp.lt.s32.totalorder %s3056_s20, %s3050_s24 }
 0x7cb   : > { %p3052_p13 = pnand %p3051_p12, %p3310_p3 }
 0x7cc   : > { %p3059_p4 = por %p3058_p2, %p3057_p1 }
 0x7cd   : > { %p3053_p0 = pneg %p3052_p13 }
 0x7cf   : > { %p3060_p5 = pnand %p3059_p4, %p3053_p0 }
 0x7d1   : > { %3063 = shalt.err (!%p3060_p5)
}
 0x7d2   : > { %s3064_s13 = scalar_lea.hbm %s4209_s16, 16  ;;  %s3068_s29 = scalar_lea.hbm %s4411_s25, 32 }
 0x7d3   : > { %p3065_p6 = scmp.ne.s32.totalorder %s4209_s16, %s3064_s13  ;;  %p3069_p10 = scmp.lt.u32.totalorder %s4209_s16, %s4411_s25 }
 0x7d4   : > { %p3070_p11 = scmp.lt.u32.totalorder %s3068_s29, %s3064_s13  ;;  %p3072_p13 = scmp.lt.u32.totalorder %s3064_s13, %s4209_s16 }
 0x7d5   : > { %p3066_p7 = pnand %p3065_p6, %p3310_p3 }
 0x7d6   : > { %p3071_p12 = por %p3070_p11, %p3069_p10 }
 0x7d7   : > { %p3067_p8 = pneg %p3066_p7 }
 0x7d8   : > { %p3073_p0 = por %p3072_p13, %p3071_p12 }
 0x7da   : > { %p3074_p1 = pnand %p3073_p0, %p3067_p8 }
 0x7dc   : > { %3077 = shalt.err (!%p3074_p1)
}
 0x7dd   : > { %2838 = dma.vmem_to_hbm [thread:$0]  (%p3310_p3), %s2273_s27, 16, %s4209_s16, %s2230_s18  }
 0x7de PF: > { %s4413_s21 = sld [smem:[#allocation21_spill]]  ;;  %s4414_s15 = sld [smem:[#allocation15_spill]] }
 0x7e4   : > { %p2852_p2 = scmp.ge.s32.totalorder %s4413_s21, 2  ;;  %s2284_s24 = sand.u32 1, %s4414_s15  }
 0x7e5   : > { %s2285_s22 = scalar_lea.sflag [#allocation9], %s2284_s24 }
 0x7e6   : > { %p2843_p4 = pnand %p2852_p2, %p3322_p9 }
 0x7e8   : > { %3111 = dma.done.wait (!%p2843_p4), %s2285_s22, 128  }
 0x7e9   : > { %3113 = vsyncadd (!%p2843_p4), %s2285_s22, 4294967168  ;;  %s4416_s1 = sadd.s32 4294967294, %s4413_s21  }
 0x7ea   : > { %s2293_s20 = sand.u32 1, %s4416_s1  }
 0x7eb   : > { %s2294_s13 = scalar_lea.sflag [#allocation11], %s2293_s20 }
 0x7ec   : > { %3115 = dma.done.wait (!%p2843_p4), %s2294_s13, 32  }
 0x7ed   : > { %3117 = vsyncadd (!%p2843_p4), %s2294_s13, 4294967264  ;;  %s36_s22 = sadd.s32 1, %s4413_s21   ;;  %s4417_s29 = sld [smem:[#allocation16_spill]] }
 0x7ee   : > { %p33_p3 = scmp.ge.s32.totalorder %s36_s22, 6   ;;  %s4418_s30 = sld [smem:[#allocation17_spill]] }
 0x7ef   : > { %s4419_s0 = sld [smem:[#allocation26_spill]]  ;;  %s4420_s19 = sld [smem:[#allocation19_spill]] }
 0x7f0   : > { %s4421_s1 = sld [smem:[#allocation20_spill]]  ;;  %s4422_s20 = sld [smem:[#allocation22_spill]] }
 0x7f1   : > { %s4423_s21 = sld [smem:[#allocation24_spill]]  ;;  %35 = sbr.rel (!%p33_p3) target bundleno = 17 (0x11), region = 165 }
 0x7f8   :  { %2306 = vsyncpa [#allocation9], 1 }
 0x7f9   :  { %2308 = vsyncpa [#allocation9 + $0x1], 1 }
 0x7fa   :  { %2309 = vsyncpa [#allocation11], 1 }
 0x7fb   :  { %2311 = vsyncpa [#allocation11 + $0x1], 1 }

</bundles_post_ra>
